<compile_context>
chip_gen: v6e
topology: v6e:2x2x1
jax: 0.10.0
libtpu: 0.0.40
codegen_flags: <defaults>
</compile_context>

<pallas_src>
import jax
import jax.numpy as jnp
from jax import lax
from jax.experimental import pallas as pl
from jax.experimental.pallas import tpu as pltpu


def bn_fold(gamma, beta, mean, var, eps=1e-5):
    scale = gamma / jnp.sqrt(var + eps)
    return scale, beta - mean * scale


def _round_up(v, m):
    return ((v + m - 1) // m) * m


def make_kernel(Mp, Wp, Ci, Co, P, in_kernel_taps, has_downsample):
    """Fused BasicBlock kernel for one image (Mp = Ho*Wp flattened padded output rows)."""
    shifts = [ki * Wp + kj for ki in range(3) for kj in range(3)]   # tap order = (ki, kj) row-major
    center = Wp + 1                                                  # tap (ki=1, kj=1)

    def kernel(*refs):
        it = iter(refs)
        x_ref = next(it)                                   # stride==1: padded input / else: im2col
        xds_ref = None if in_kernel_taps else next(it)     # strided residual input (stride != 1)
        w1_ref = next(it)
        w2_ref = next(it)
        wd_ref = next(it) if has_downsample else None
        s1_ref = next(it); b1_ref = next(it)
        s2_ref = next(it); b2_ref = next(it)
        if has_downsample:
            sd_ref = next(it); bd_ref = next(it)
        mask_ref = next(it)
        o_ref = next(it)
        ypad_ref = next(it)                                # (2P + Mp, Co) bf16 stage-1 activation
        xcol2_ref = next(it)                               # (Mp, 9*Co) bf16 conv2 fused-K operand
        xcol1_ref = next(it) if in_kernel_taps else None   # (Mp, 9*Ci) bf16 conv1 fused-K operand

        # Zero only the halo strips of the padded activation buffer; the interior is fully
        # overwritten every grid step (safe when the "parallel" axis is sharded across cores).
        ypad_ref[0:P, :] = jnp.zeros((P, Co), jnp.bfloat16)
        ypad_ref[P + Mp:P + Mp + P, :] = jnp.zeros((P, Co), jnp.bfloat16)

        # ---- conv1 (3x3, stride s): one K=9*Ci bf16 matmul + folded BN1 + ReLU ----
        if in_kernel_taps:
            for t, k in enumerate(shifts):                 # build im2col operand in VMEM
                xcol1_ref[:, t * Ci:(t + 1) * Ci] = x_ref[0, k:k + Mp, :]
            op1 = xcol1_ref[...]
        else:
            op1 = x_ref[0]                                 # wrapper-side im2col (stride != 1)
        acc1 = jnp.dot(op1, w1_ref[...], preferred_element_type=jnp.float32)
        y = jnp.maximum(acc1 * s1_ref[...] + b1_ref[...], 0.0)      # (Mp, Co) f32
        y = y * mask_ref[...]                              # zero pad columns (one VPU mul)
        ypad_ref[P:P + Mp, :] = y.astype(jnp.bfloat16)     # cast once for conv2's bf16 MXU

        # ---- conv2 (3x3, stride 1, pad 1): one K=9*Co bf16 matmul + folded BN2 ----
        for t, k in enumerate(shifts):
            src = P + k - center                           # static shifts, halo keeps them in bounds
            xcol2_ref[:, t * Co:(t + 1) * Co] = ypad_ref[src:src + Mp, :]
        out = jnp.dot(xcol2_ref[...], w2_ref[...], preferred_element_type=jnp.float32)
        out = out * s2_ref[...] + b2_ref[...]

        # ---- identity / downsample (1x1 conv, stride s) + folded BN ----
        if has_downsample:
            res_in = (x_ref[0, center:center + Mp, :] if in_kernel_taps else xds_ref[0])
            iden = jnp.dot(res_in, wd_ref[...], preferred_element_type=jnp.float32)
            iden = iden * sd_ref[...] + bd_ref[...]
        else:
            iden = x_ref[0, center:center + Mp, :].astype(jnp.float32)   # center tap == x[ho, wo]

        o_ref[0] = jnp.maximum(out + iden, 0.0)

    return kernel


def basic_block_forward(x, params, stride=1):
    """Fused BasicBlock forward. x: NCHW float32. Returns NCHW float32."""
    N, Ci, H, W = map(int, x.shape)
    w1 = params["conv1_w"]
    Co = int(w1.shape[0])
    stride = int(stride)
    Ho = (H + 2 - 3) // stride + 1
    Wo = (W + 2 - 3) // stride + 1
    Wp = _round_up(Wo + 2, 8)          # padded output-grid columns (>=1 zero col each side), 8-aligned
    Mp = Ho * Wp                       # flattened padded output rows per image
    P = _round_up(Wp + 1, 16)          # top/bottom halo rows for conv2's +-Wp+-1 shifts
    has_downsample = params["downsample"] is not None
    in_kernel_taps = (stride == 1)
    if not has_downsample:
        assert stride == 1 and Ci == Co, "identity path requires stride=1 and in_channels == out_channels"

    xh = jnp.transpose(x, (0, 2, 3, 1)).astype(jnp.float32)          # NHWC

    # folded (inference) BatchNorm params
    s1, b1 = bn_fold(*params["bn1"]); s2, b2 = bn_fold(*params["bn2"])
    s1 = s1.reshape(1, Co); b1 = b1.reshape(1, Co)
    s2 = s2.reshape(1, Co); b2 = b2.reshape(1, Co)

    # weights: PyTorch OIHW -> (kh, kw, I, O) -> (9*I, O), bf16 MXU operands
    w1f = jnp.transpose(w1, (2, 3, 1, 0)).reshape(9 * Ci, Co).astype(jnp.bfloat16)
    w2f = jnp.transpose(params["conv2_w"], (2, 3, 1, 0)).reshape(9 * Co, Co).astype(jnp.bfloat16)

    # (Mp, 1) valid-column mask over the padded output grid (replaces in-kernel iota/floor math)
    jpos = jnp.arange(Mp, dtype=jnp.int32) % Wp
    colmask = ((jpos >= 1) & (jpos <= Wo)).astype(jnp.float32).reshape(Mp, 1)

    def per_image(rows, ch):
        return pl.BlockSpec((1, rows, ch), lambda n: (n, 0, 0))

    def const2(a):
        return pl.BlockSpec(a.shape, lambda n: (0, 0))

    inputs, in_specs = [], []

    if in_kernel_taps:
        # Padded input flattened into rows of Wp columns; +1 lead / +7 tail rows so every conv1
        # tap slice [k, k+Mp) with k = ki*Wp + kj stays in bounds.  No 9x im2col blowup in HBM.
        Hp = H + 2
        xpad = jnp.pad(xh, ((0, 0), (1, 1), (1, Wp - W - 1), (0, 0)))        # (N, Hp, Wp, Ci)
        Lin = Hp * Wp + 8
        xin = jnp.pad(xpad.reshape(N, Hp * Wp, Ci), ((0, 0), (1, 7), (0, 0)))
        inputs.append(xin.astype(jnp.bfloat16))
        in_specs.append(per_image(Lin, Ci))
    else:
        # stride != 1: conv1 im2col (taps concatenated on channels, K = 9*Ci) built by XLA.
        xpad = jnp.pad(xh, ((0, 0), (1, 1), (1, 1), (0, 0)))
        taps = [xpad[:, ki:ki + stride * (Ho - 1) + 1:stride,
                        kj:kj + stride * (Wo - 1) + 1:stride, :]
                for ki in range(3) for kj in range(3)]
        xt1 = jnp.concatenate(taps, axis=-1)                                  # (N, Ho, Wo, 9*Ci)
        xt1 = jnp.pad(xt1, ((0, 0), (0, 0), (1, Wp - Wo - 1), (0, 0)))
        xt1 = xt1.reshape(N, Mp, 9 * Ci).astype(jnp.bfloat16)
        xds = xh[:, 0:stride * (Ho - 1) + 1:stride, 0:stride * (Wo - 1) + 1:stride, :]
        xds = jnp.pad(xds, ((0, 0), (0, 0), (1, Wp - Wo - 1), (0, 0)))
        xds = xds.reshape(N, Mp, Ci).astype(jnp.bfloat16)
        inputs += [xt1, xds]
        in_specs += [per_image(Mp, 9 * Ci), per_image(Mp, Ci)]

    inputs += [w1f, w2f]
    in_specs += [const2(w1f), const2(w2f)]

    if has_downsample:
        wdf = jnp.transpose(params["downsample"]["conv_w"][:, :, 0, 0]).astype(jnp.bfloat16)  # (Ci, Co)
        inputs.append(wdf)
        in_specs.append(const2(wdf))

    inputs += [s1, b1, s2, b2]
    in_specs += [const2(s1), const2(b1), const2(s2), const2(b2)]

    if has_downsample:
        sd, bd = bn_fold(*params["downsample"]["bn"])
        sd = sd.reshape(1, Co); bd = bd.reshape(1, Co)
        inputs += [sd, bd]
        in_specs += [const2(sd), const2(bd)]

    inputs.append(colmask)
    in_specs.append(const2(colmask))

    scratch_shapes = [pltpu.VMEM((Mp + 2 * P, Co), jnp.bfloat16),    # padded stage-1 activation
                      pltpu.VMEM((Mp, 9 * Co), jnp.bfloat16)]        # conv2 fused-K operand
    if in_kernel_taps:
        scratch_shapes.append(pltpu.VMEM((Mp, 9 * Ci), jnp.bfloat16))  # conv1 fused-K operand

    kernel = make_kernel(Mp, Wp, Ci, Co, P, in_kernel_taps, has_downsample)

    grid_spec = pltpu.PrefetchScalarGridSpec(
        num_scalar_prefetch=0,
        grid=(N,),                                    # one image per step; DMAs double-buffered
        in_specs=in_specs,
        out_specs=pl.BlockSpec((1, Mp, Co), lambda n: (n, 0, 0)),
        scratch_shapes=scratch_shapes,
    )

    out_flat = pl.pallas_call(
        kernel,
        out_shape=jax.ShapeDtypeStruct((N, Mp, Co), jnp.float32),
        grid_spec=grid_spec,
        compiler_params=pltpu.CompilerParams(
            dimension_semantics=("parallel",),
            vmem_limit_bytes=32 * 1024 * 1024),
    )(*inputs)

    out = out_flat.reshape(N, Ho, Wp, Co)[:, :, 1:1 + Wo, :]          # drop pad columns
    return jnp.transpose(out, (0, 3, 1, 2))                           # back to NCHW


def basic_block_reference(x, params, stride=1):
    """Pure-JAX reference (lax.conv at HIGHEST precision) for validation."""
    dn = ("NHWC", "HWIO", "NHWC")
    hi = lax.Precision.HIGHEST
    xh = jnp.transpose(x, (0, 2, 3, 1)).astype(jnp.float32)

    def conv(inp, w, s, pad):
        return lax.conv_general_dilated(inp, jnp.transpose(w, (2, 3, 1, 0)),
                                        (s, s), pad, dimension_numbers=dn, precision=hi)

    s1, b1 = bn_fold(*params["bn1"])
    out = jnp.maximum(conv(xh, params["conv1_w"], stride, ((1, 1), (1, 1))) * s1 + b1, 0.0)
    s2, b2 = bn_fold(*params["bn2"])
    out = conv(out, params["conv2_w"], 1, ((1, 1), (1, 1))) * s2 + b2
    if params["downsample"] is None:
        iden = xh
    else:
        sd, bd = bn_fold(*params["downsample"]["bn"])
        iden = conv(xh, params["downsample"]["conv_w"], stride, ((0, 0), (0, 0))) * sd + bd
    return jnp.transpose(jnp.maximum(out + iden, 0.0), (0, 3, 1, 2))


def init_basic_block_params(key, in_ch, out_ch, stride):
    ks = jax.random.split(key, 6)

    def bn_params(k):
        k0, k1, k2, k3 = jax.random.split(k, 4)
        gamma = jax.random.uniform(k0, (out_ch,), jnp.float32, 0.8, 1.2)
        beta = 0.05 * jax.random.normal(k1, (out_ch,), jnp.float32)
        mean = 0.05 * jax.random.normal(k2, (out_ch,), jnp.float32)
        var = jax.random.uniform(k3, (out_ch,), jnp.float32, 0.5, 1.5)
        return (gamma, beta, mean, var)

    params = {
        "conv1_w": 0.2 * jax.random.normal(ks[0], (out_ch, in_ch, 3, 3), jnp.float32),
        "bn1": bn_params(ks[1]),
        "conv2_w": 0.2 * jax.random.normal(ks[2], (out_ch, out_ch, 3, 3), jnp.float32),
        "bn2": bn_params(ks[3]),
        "downsample": None,
    }
    if stride != 1 or in_ch != out_ch:
        params["downsample"] = {
            "conv_w": 0.2 * jax.random.normal(ks[4], (out_ch, in_ch, 1, 1), jnp.float32),
            "bn": bn_params(ks[5]),
        }
    return params


def _check(x, params, stride, expect_shape):
    y = jax.block_until_ready(basic_block_forward(x, params, stride))
    y_ref = basic_block_reference(x, params, stride)
    assert y.shape == expect_shape, y.shape
    err = float(jnp.max(jnp.abs(y - y_ref)))
    scale = float(jnp.max(jnp.abs(y_ref)))
    # bf16 MXU operands (f32 accumulation) vs. an f32 HIGHEST-precision reference
    assert err <= 5e-2 * max(1.0, scale), (err, scale)


if __name__ == "__main__":
    key = jax.random.PRNGKey(0)
    k1, k2, k3, k4 = jax.random.split(key, 4)

    # downsample branch (stride 2, channel change) -- wrapper-side im2col path
    N, Ci, H, W, Co, stride = 2, 4, 16, 16, 8, 2
    x = jax.random.normal(k1, (N, Ci, H, W), jnp.float32)
    params = init_basic_block_params(k2, Ci, Co, stride)
    _check(x, params, stride, (N, Co, H // stride, W // stride))

    # identity branch (stride 1, same channels) -- in-kernel conv1 taps, residual from center tap
    N, Ci, H, W, Co, stride = 2, 8, 8, 8, 8, 1
    x = jax.random.normal(k3, (N, Ci, H, W), jnp.float32)
    params = init_basic_block_params(k4, Ci, Co, stride)
    _check(x, params, stride, (N, Co, H, W))

    print("KERNEL_OK")
</pallas_src>

<mosaic_0001>
module attributes {stable_mosaic.version = 11 : i64} {
  func.func @kernel(%arg0: i32, %arg1: memref<1x128x36xbf16, #tpu.memory_space<vmem>>, %arg2: memref<1x128x4xbf16, #tpu.memory_space<vmem>>, %arg3: memref<36x8xbf16, #tpu.memory_space<vmem>>, %arg4: memref<72x8xbf16, #tpu.memory_space<vmem>>, %arg5: memref<4x8xbf16, #tpu.memory_space<vmem>>, %arg6: memref<1x8xf32, #tpu.memory_space<vmem>>, %arg7: memref<1x8xf32, #tpu.memory_space<vmem>>, %arg8: memref<1x8xf32, #tpu.memory_space<vmem>>, %arg9: memref<1x8xf32, #tpu.memory_space<vmem>>, %arg10: memref<1x8xf32, #tpu.memory_space<vmem>>, %arg11: memref<1x8xf32, #tpu.memory_space<vmem>>, %arg12: memref<128x1xf32, #tpu.memory_space<vmem>>, %arg13: memref<1x128x8xf32, #tpu.memory_space<vmem>>, %arg14: memref<192x8xbf16, #tpu.memory_space<vmem>>, %arg15: memref<128x72xbf16, #tpu.memory_space<vmem>>) attributes {dimension_semantics = [#tpu.dimension_semantics<parallel>], iteration_bounds = array<i64: 2>, scalar_prefetch = 0 : i64, scratch_operands = 2 : i64, tpu.core_type = #tpu.core_type<tc>, window_params = [{transform_indices = @transform_0, window_bounds = array<i64: 1, 128, 36>}, {transform_indices = @transform_1, window_bounds = array<i64: 1, 128, 4>}, {pipeline_mode = #tpu.pipeline_mode<synchronous>, transform_indices = @transform_2, window_bounds = array<i64: 36, 8>}, {pipeline_mode = #tpu.pipeline_mode<synchronous>, transform_indices = @transform_3, window_bounds = array<i64: 72, 8>}, {pipeline_mode = #tpu.pipeline_mode<synchronous>, transform_indices = @transform_4, window_bounds = array<i64: 4, 8>}, {pipeline_mode = #tpu.pipeline_mode<synchronous>, transform_indices = @transform_5, window_bounds = array<i64: 1, 8>}, {pipeline_mode = #tpu.pipeline_mode<synchronous>, transform_indices = @transform_6, window_bounds = array<i64: 1, 8>}, {pipeline_mode = #tpu.pipeline_mode<synchronous>, transform_indices = @transform_7, window_bounds = array<i64: 1, 8>}, {pipeline_mode = #tpu.pipeline_mode<synchronous>, transform_indices = @transform_8, window_bounds = array<i64: 1, 8>}, {pipeline_mode = #tpu.pipeline_mode<synchronous>, transform_indices = @transform_9, window_bounds = array<i64: 1, 8>}, {pipeline_mode = #tpu.pipeline_mode<synchronous>, transform_indices = @transform_10, window_bounds = array<i64: 1, 8>}, {pipeline_mode = #tpu.pipeline_mode<synchronous>, transform_indices = @transform_11, window_bounds = array<i64: 128, 1>}, {transform_indices = @transform_12, window_bounds = array<i64: 1, 128, 8>}]} {
    %cst = arith.constant 0.000000e+00 : bf16
    %0 = vector.broadcast %cst : bf16 to vector<32x8xbf16>
    %c0 = arith.constant 0 : index
    %c0_0 = arith.constant 0 : index
    %1 = vector.load %arg14[%c0, %c0_0] : memref<192x8xbf16, #tpu.memory_space<vmem>>, vector<32x8xbf16>
    tpu.vector_store %arg14[%c0, %c0_0], %0 {strides = array<i32>} : memref<192x8xbf16, #tpu.memory_space<vmem>>, vector<32x8xbf16>,
    %cst_1 = arith.constant 0.000000e+00 : bf16
    %2 = vector.broadcast %cst_1 : bf16 to vector<32x8xbf16>
    %c160 = arith.constant 160 : index
    %c0_2 = arith.constant 0 : index
    %3 = vector.load %arg14[%c160, %c0_2] : memref<192x8xbf16, #tpu.memory_space<vmem>>, vector<32x8xbf16>
    tpu.vector_store %arg14[%c160, %c0_2], %2 {strides = array<i32>} : memref<192x8xbf16, #tpu.memory_space<vmem>>, vector<32x8xbf16>,
    %c0_3 = arith.constant 0 : index
    %c0_4 = arith.constant 0 : index
    %c0_5 = arith.constant 0 : index
    %4 = vector.load %arg1[%c0_3, %c0_4, %c0_5] : memref<1x128x36xbf16, #tpu.memory_space<vmem>>, vector<1x128x36xbf16>
    %5 = vector.shape_cast %4 : vector<1x128x36xbf16> to vector<128x36xbf16>
    %c0_6 = arith.constant 0 : index
    %c0_7 = arith.constant 0 : index
    %6 = vector.load %arg3[%c0_6, %c0_7] : memref<36x8xbf16, #tpu.memory_space<vmem>>, vector<36x8xbf16>
    %cst_8 = arith.constant dense<0.000000e+00> : vector<128x8xf32>
    %7 = tpu.matmul %5, %6, %cst_8 {dimension_numbers = #tpu.dot_dimension_numbers<[1], [0], [0], [1], [0, 0, 1, 1], [], []>} : vector<128x36xbf16>, vector<36x8xbf16>, vector<128x8xf32> -> vector<128x8xf32>
    %c0_9 = arith.constant 0 : index
    %c0_10 = arith.constant 0 : index
    %8 = vector.load %arg6[%c0_9, %c0_10] : memref<1x8xf32, #tpu.memory_space<vmem>>, vector<1x8xf32>
    %9 = vector.broadcast %8 : vector<1x8xf32> to vector<128x8xf32>
    %10 = arith.mulf %7, %9 : vector<128x8xf32>
    %c0_11 = arith.constant 0 : index
    %c0_12 = arith.constant 0 : index
    %11 = vector.load %arg7[%c0_11, %c0_12] : memref<1x8xf32, #tpu.memory_space<vmem>>, vector<1x8xf32>
    %12 = vector.broadcast %11 : vector<1x8xf32> to vector<128x8xf32>
    %13 = arith.addf %10, %12 : vector<128x8xf32>
    %cst_13 = arith.constant 0.000000e+00 : f32
    %14 = vector.broadcast %cst_13 : f32 to vector<128x8xf32>
    %15 = arith.maximumf %13, %14 : vector<128x8xf32>
    %c0_14 = arith.constant 0 : index
    %c0_15 = arith.constant 0 : index
    %16 = vector.load %arg12[%c0_14, %c0_15] : memref<128x1xf32, #tpu.memory_space<vmem>>, vector<128x1xf32>
    %17 = vector.broadcast %16 : vector<128x1xf32> to vector<128x8xf32>
    %18 = arith.mulf %15, %17 : vector<128x8xf32>
    %19 = arith.truncf %18 : vector<128x8xf32> to vector<128x8xbf16>
    %c32 = arith.constant 32 : index
    %c0_16 = arith.constant 0 : index
    %20 = vector.load %arg14[%c32, %c0_16] : memref<192x8xbf16, #tpu.memory_space<vmem>>, vector<128x8xbf16>
    tpu.vector_store %arg14[%c32, %c0_16], %19 {strides = array<i32>} : memref<192x8xbf16, #tpu.memory_space<vmem>>, vector<128x8xbf16>,
    %c15 = arith.constant 15 : index
    %c0_17 = arith.constant 0 : index
    %21 = vector.load %arg14[%c15, %c0_17] : memref<192x8xbf16, #tpu.memory_space<vmem>>, vector<128x8xbf16>
    %c0_18 = arith.constant 0 : index
    %c0_19 = arith.constant 0 : index
    %22 = vector.load %arg15[%c0_18, %c0_19] : memref<128x72xbf16, #tpu.memory_space<vmem>>, vector<128x8xbf16>
    tpu.vector_store %arg15[%c0_18, %c0_19], %21 {strides = array<i32>} : memref<128x72xbf16, #tpu.memory_space<vmem>>, vector<128x8xbf16>,
    %c16 = arith.constant 16 : index
    %c0_20 = arith.constant 0 : index
    %23 = vector.load %arg14[%c16, %c0_20] : memref<192x8xbf16, #tpu.memory_space<vmem>>, vector<128x8xbf16>
    %c0_21 = arith.constant 0 : index
    %c8 = arith.constant 8 : index
    %24 = vector.load %arg15[%c0_21, %c8] : memref<128x72xbf16, #tpu.memory_space<vmem>>, vector<128x8xbf16>
    tpu.vector_store %arg15[%c0_21, %c8], %23 {strides = array<i32>} : memref<128x72xbf16, #tpu.memory_space<vmem>>, vector<128x8xbf16>,
    %c17 = arith.constant 17 : index
    %c0_22 = arith.constant 0 : index
    %25 = vector.load %arg14[%c17, %c0_22] : memref<192x8xbf16, #tpu.memory_space<vmem>>, vector<128x8xbf16>
    %c0_23 = arith.constant 0 : index
    %c16_24 = arith.constant 16 : index
    %26 = vector.load %arg15[%c0_23, %c16_24] : memref<128x72xbf16, #tpu.memory_space<vmem>>, vector<128x8xbf16>
    tpu.vector_store %arg15[%c0_23, %c16_24], %25 {strides = array<i32>} : memref<128x72xbf16, #tpu.memory_space<vmem>>, vector<128x8xbf16>,
    %c31 = arith.constant 31 : index
    %c0_25 = arith.constant 0 : index
    %27 = vector.load %arg14[%c31, %c0_25] : memref<192x8xbf16, #tpu.memory_space<vmem>>, vector<128x8xbf16>
    %c0_26 = arith.constant 0 : index
    %c24 = arith.constant 24 : index
    %28 = vector.load %arg15[%c0_26, %c24] : memref<128x72xbf16, #tpu.memory_space<vmem>>, vector<128x8xbf16>
    tpu.vector_store %arg15[%c0_26, %c24], %27 {strides = array<i32>} : memref<128x72xbf16, #tpu.memory_space<vmem>>, vector<128x8xbf16>,
    %c32_27 = arith.constant 32 : index
    %c0_28 = arith.constant 0 : index
    %29 = vector.load %arg14[%c32_27, %c0_28] : memref<192x8xbf16, #tpu.memory_space<vmem>>, vector<128x8xbf16>
    %c0_29 = arith.constant 0 : index
    %c32_30 = arith.constant 32 : index
    %30 = vector.load %arg15[%c0_29, %c32_30] : memref<128x72xbf16, #tpu.memory_space<vmem>>, vector<128x8xbf16>
    tpu.vector_store %arg15[%c0_29, %c32_30], %29 {strides = array<i32>} : memref<128x72xbf16, #tpu.memory_space<vmem>>, vector<128x8xbf16>,
    %c33 = arith.constant 33 : index
    %c0_31 = arith.constant 0 : index
    %31 = vector.load %arg14[%c33, %c0_31] : memref<192x8xbf16, #tpu.memory_space<vmem>>, vector<128x8xbf16>
    %c0_32 = arith.constant 0 : index
    %c40 = arith.constant 40 : index
    %32 = vector.load %arg15[%c0_32, %c40] : memref<128x72xbf16, #tpu.memory_space<vmem>>, vector<128x8xbf16>
    tpu.vector_store %arg15[%c0_32, %c40], %31 {strides = array<i32>} : memref<128x72xbf16, #tpu.memory_space<vmem>>, vector<128x8xbf16>,
    %c47 = arith.constant 47 : index
    %c0_33 = arith.constant 0 : index
    %33 = vector.load %arg14[%c47, %c0_33] : memref<192x8xbf16, #tpu.memory_space<vmem>>, vector<128x8xbf16>
    %c0_34 = arith.constant 0 : index
    %c48 = arith.constant 48 : index
    %34 = vector.load %arg15[%c0_34, %c48] : memref<128x72xbf16, #tpu.memory_space<vmem>>, vector<128x8xbf16>
    tpu.vector_store %arg15[%c0_34, %c48], %33 {strides = array<i32>} : memref<128x72xbf16, #tpu.memory_space<vmem>>, vector<128x8xbf16>,
    %c48_35 = arith.constant 48 : index
    %c0_36 = arith.constant 0 : index
    %35 = vector.load %arg14[%c48_35, %c0_36] : memref<192x8xbf16, #tpu.memory_space<vmem>>, vector<128x8xbf16>
    %c0_37 = arith.constant 0 : index
    %c56 = arith.constant 56 : index
    %36 = vector.load %arg15[%c0_37, %c56] : memref<128x72xbf16, #tpu.memory_space<vmem>>, vector<128x8xbf16>
    tpu.vector_store %arg15[%c0_37, %c56], %35 {strides = array<i32>} : memref<128x72xbf16, #tpu.memory_space<vmem>>, vector<128x8xbf16>,
    %c49 = arith.constant 49 : index
    %c0_38 = arith.constant 0 : index
    %37 = vector.load %arg14[%c49, %c0_38] : memref<192x8xbf16, #tpu.memory_space<vmem>>, vector<128x8xbf16>
    %c0_39 = arith.constant 0 : index
    %c64 = arith.constant 64 : index
    %38 = vector.load %arg15[%c0_39, %c64] : memref<128x72xbf16, #tpu.memory_space<vmem>>, vector<128x8xbf16>
    tpu.vector_store %arg15[%c0_39, %c64], %37 {strides = array<i32>} : memref<128x72xbf16, #tpu.memory_space<vmem>>, vector<128x8xbf16>,
    %c0_40 = arith.constant 0 : index
    %c0_41 = arith.constant 0 : index
    %39 = vector.load %arg15[%c0_40, %c0_41] : memref<128x72xbf16, #tpu.memory_space<vmem>>, vector<128x72xbf16>
    %c0_42 = arith.constant 0 : index
    %c0_43 = arith.constant 0 : index
    %40 = vector.load %arg4[%c0_42, %c0_43] : memref<72x8xbf16, #tpu.memory_space<vmem>>, vector<72x8xbf16>
    %cst_44 = arith.constant dense<0.000000e+00> : vector<128x8xf32>
    %41 = tpu.matmul %39, %40, %cst_44 {dimension_numbers = #tpu.dot_dimension_numbers<[1], [0], [0], [1], [0, 0, 1, 1], [], []>} : vector<128x72xbf16>, vector<72x8xbf16>, vector<128x8xf32> -> vector<128x8xf32>
    %c0_45 = arith.constant 0 : index
    %c0_46 = arith.constant 0 : index
    %42 = vector.load %arg8[%c0_45, %c0_46] : memref<1x8xf32, #tpu.memory_space<vmem>>, vector<1x8xf32>
    %43 = vector.broadcast %42 : vector<1x8xf32> to vector<128x8xf32>
    %44 = arith.mulf %41, %43 : vector<128x8xf32>
    %c0_47 = arith.constant 0 : index
    %c0_48 = arith.constant 0 : index
    %45 = vector.load %arg9[%c0_47, %c0_48] : memref<1x8xf32, #tpu.memory_space<vmem>>, vector<1x8xf32>
    %46 = vector.broadcast %45 : vector<1x8xf32> to vector<128x8xf32>
    %47 = arith.addf %44, %46 : vector<128x8xf32>
    %c0_49 = arith.constant 0 : index
    %c0_50 = arith.constant 0 : index
    %c0_51 = arith.constant 0 : index
    %48 = vector.load %arg2[%c0_49, %c0_50, %c0_51] : memref<1x128x4xbf16, #tpu.memory_space<vmem>>, vector<1x128x4xbf16>
    %49 = vector.shape_cast %48 : vector<1x128x4xbf16> to vector<128x4xbf16>
    %c0_52 = arith.constant 0 : index
    %c0_53 = arith.constant 0 : index
    %50 = vector.load %arg5[%c0_52, %c0_53] : memref<4x8xbf16, #tpu.memory_space<vmem>>, vector<4x8xbf16>
    %cst_54 = arith.constant dense<0.000000e+00> : vector<128x8xf32>
    %51 = tpu.matmul %49, %50, %cst_54 {dimension_numbers = #tpu.dot_dimension_numbers<[1], [0], [0], [1], [0, 0, 1, 1], [], []>} : vector<128x4xbf16>, vector<4x8xbf16>, vector<128x8xf32> -> vector<128x8xf32>
    %c0_55 = arith.constant 0 : index
    %c0_56 = arith.constant 0 : index
    %52 = vector.load %arg10[%c0_55, %c0_56] : memref<1x8xf32, #tpu.memory_space<vmem>>, vector<1x8xf32>
    %53 = vector.broadcast %52 : vector<1x8xf32> to vector<128x8xf32>
    %54 = arith.mulf %51, %53 : vector<128x8xf32>
    %c0_57 = arith.constant 0 : index
    %c0_58 = arith.constant 0 : index
    %55 = vector.load %arg11[%c0_57, %c0_58] : memref<1x8xf32, #tpu.memory_space<vmem>>, vector<1x8xf32>
    %56 = vector.broadcast %55 : vector<1x8xf32> to vector<128x8xf32>
    %57 = arith.addf %54, %56 : vector<128x8xf32>
    %58 = arith.addf %47, %57 : vector<128x8xf32>
    %cst_59 = arith.constant 0.000000e+00 : f32
    %59 = vector.broadcast %cst_59 : f32 to vector<128x8xf32>
    %60 = arith.maximumf %58, %59 : vector<128x8xf32>
    %c0_60 = arith.constant 0 : index
    %c0_61 = arith.constant 0 : index
    %c0_62 = arith.constant 0 : index
    %61 = vector.load %arg13[%c0_60, %c0_61, %c0_62] : memref<1x128x8xf32, #tpu.memory_space<vmem>>, vector<1x128x8xf32>
    %62 = vector.shape_cast %61 : vector<1x128x8xf32> to vector<128x8xf32>
    %63 = vector.shape_cast %60 : vector<128x8xf32> to vector<1x128x8xf32>
    tpu.vector_store %arg13[%c0_60, %c0_61, %c0_62], %63 {strides = array<i32>} : memref<1x128x8xf32, #tpu.memory_space<vmem>>, vector<1x128x8xf32>,
    return
  }
  func.func @transform_0(%arg0: i32) -> (i32, i32, i32) {
    %c0_i32 = arith.constant 0 : i32
    %c0_i32_0 = arith.constant 0 : i32
    %c0_i32_1 = arith.constant 0 : i32
    return %arg0, %c0_i32, %c0_i32_0 : i32, i32, i32
  }
  func.func @transform_1(%arg0: i32) -> (i32, i32, i32) {
    %c0_i32 = arith.constant 0 : i32
    %c0_i32_0 = arith.constant 0 : i32
    %c0_i32_1 = arith.constant 0 : i32
    return %arg0, %c0_i32, %c0_i32_0 : i32, i32, i32
  }
  func.func @transform_2(%arg0: i32) -> (i32, i32) {
    %c0_i32 = arith.constant 0 : i32
    %c0_i32_0 = arith.constant 0 : i32
    %c0_i32_1 = arith.constant 0 : i32
    return %c0_i32, %c0_i32_0 : i32, i32
  }
  func.func @transform_3(%arg0: i32) -> (i32, i32) {
    %c0_i32 = arith.constant 0 : i32
    %c0_i32_0 = arith.constant 0 : i32
    %c0_i32_1 = arith.constant 0 : i32
    return %c0_i32, %c0_i32_0 : i32, i32
  }
  func.func @transform_4(%arg0: i32) -> (i32, i32) {
    %c0_i32 = arith.constant 0 : i32
    %c0_i32_0 = arith.constant 0 : i32
    %c0_i32_1 = arith.constant 0 : i32
    return %c0_i32, %c0_i32_0 : i32, i32
  }
  func.func @transform_5(%arg0: i32) -> (i32, i32) {
    %c0_i32 = arith.constant 0 : i32
    %c0_i32_0 = arith.constant 0 : i32
    %c0_i32_1 = arith.constant 0 : i32
    return %c0_i32, %c0_i32_0 : i32, i32
  }
  func.func @transform_6(%arg0: i32) -> (i32, i32) {
    %c0_i32 = arith.constant 0 : i32
    %c0_i32_0 = arith.constant 0 : i32
    %c0_i32_1 = arith.constant 0 : i32
    return %c0_i32, %c0_i32_0 : i32, i32
  }
  func.func @transform_7(%arg0: i32) -> (i32, i32) {
    %c0_i32 = arith.constant 0 : i32
    %c0_i32_0 = arith.constant 0 : i32
    %c0_i32_1 = arith.constant 0 : i32
    return %c0_i32, %c0_i32_0 : i32, i32
  }
  func.func @transform_8(%arg0: i32) -> (i32, i32) {
    %c0_i32 = arith.constant 0 : i32
    %c0_i32_0 = arith.constant 0 : i32
    %c0_i32_1 = arith.constant 0 : i32
    return %c0_i32, %c0_i32_0 : i32, i32
  }
  func.func @transform_9(%arg0: i32) -> (i32, i32) {
    %c0_i32 = arith.constant 0 : i32
    %c0_i32_0 = arith.constant 0 : i32
    %c0_i32_1 = arith.constant 0 : i32
    return %c0_i32, %c0_i32_0 : i32, i32
  }
  func.func @transform_10(%arg0: i32) -> (i32, i32) {
    %c0_i32 = arith.constant 0 : i32
    %c0_i32_0 = arith.constant 0 : i32
    %c0_i32_1 = arith.constant 0 : i32
    return %c0_i32, %c0_i32_0 : i32, i32
  }
  func.func @transform_11(%arg0: i32) -> (i32, i32) {
    %c0_i32 = arith.constant 0 : i32
    %c0_i32_0 = arith.constant 0 : i32
    %c0_i32_1 = arith.constant 0 : i32
    return %c0_i32, %c0_i32_0 : i32, i32
  }
  func.func @transform_12(%arg0: i32) -> (i32, i32, i32) {
    %c0_i32 = arith.constant 0 : i32
    %c0_i32_0 = arith.constant 0 : i32
    %c0_i32_1 = arith.constant 0 : i32
    return %arg0, %c0_i32, %c0_i32_0 : i32, i32, i32
  }
}

</mosaic_0001>

<bundles_post_ra>
// kernel: tpu_custom_call.1
= control target key start
LH: loop header
LB: loop body
LE: loop exit
PB: predicated region body
PF: predicated region fallthrough
CT: control target
= control target key end

     0   :  { %s3555_s21 = smov 0   ;;  %s4962_s0 = inlined_call_operand.vmem [shape: bf16[2,128,36], index: 0, kind: input, shape index: {}]   ;;  %s4963_s1 = inlined_call_operand.vmem [shape: bf16[2,128,4], index: 1, kind: input, shape index: {}]   ;;  %s4964_s2 = inlined_call_operand.vmem [shape: bf16[36,8], index: 2, kind: input, shape index: {}]   ;;  %s4965_s3 = inlined_call_operand.vmem [shape: bf16[72,8], index: 3, kind: input, shape index: {}]   ;;  %s4966_s4 = inlined_call_operand.vmem [shape: bf16[4,8], index: 4, kind: input, shape index: {}]   ;;  %s4967_s5 = inlined_call_operand.vmem [shape: f32[1,8], index: 5, kind: input, shape index: {}]   ;;  %s4968_s6 = inlined_call_operand.vmem [shape: f32[1,8], index: 6, kind: input, shape index: {}]   ;;  %s4969_s7 = inlined_call_operand.vmem [shape: f32[1,8], index: 7, kind: input, shape index: {}]   ;;  %s4970_s8 = inlined_call_operand.vmem [shape: f32[1,8], index: 8, kind: input, shape index: {}]   ;;  %s4971_s9 = inlined_call_operand.vmem [shape: f32[1,8], index: 9, kind: input, shape index: {}]   ;;  %s4972_s10 = inlined_call_operand.vmem [shape: f32[1,8], index: 10, kind: input, shape index: {}]   ;;  %s4973_s11 = inlined_call_operand.vmem [shape: f32[128,1], index: 11, kind: input, shape index: {}]   ;;  %s4974_s12 = inlined_call_operand.vmem [shape: f32[2,128,8], index: 12, kind: output, shape index: {}]  }
   0x1 LB: > { %s3200_s22 = sadd.s32 4294967295, %s3479_s21   ;;  %p3204_p0 = scmp.ge.s32.totalorder %s3479_s21, 1  ;;  %s3479_s21 = sphi %s3555_s21, %s22_s21  }
   0x2   : > { %p372_p1 = scmp.lt.s32.totalorder %s3479_s21, 3 }
   0x4   : > { %p373_p2 = pnand %p3204_p0, %p372_p1 }
   0x5   : > { %p419_p3 = scmp.lt.s32.totalorder (!%p373_p2), %s3200_s22, 1  ;;  %s3482_s23 = smov (!%p373_p2), 8  }
   0x6   : > { %376 = sbr.rel (%p373_p2) target bundleno = 821 (0x335), region = 68  ;;  %s3483_s24 = smov (!%p373_p2), 16  }
   0x7   : > { %s3484_s28 = smov (!%p373_p2), 32   ;;  %s3485_s29 = smov (!%p373_p2), 56  }
   0x8   : > { %s3486_s30 = smov (!%p373_p2), 24   ;;  %s3487_s13 = smov (!%p373_p2), 48  }
   0x9   : > { %s3488_s14 = smov (!%p373_p2), 40   ;;  %s3489_s16 = smov (!%p373_p2), 64  }
   0xb   : > { %v3441_v0 = vld [vmem:[%s4964_s2 + $0x10] ss:$0 sps:$4 sm:$0x33]   ;;  %vm545_vm0 = vcmask 1041408   ;;  %v3442_v1 = vld [vmem:[%s4964_s2 + $0x8] sm:$0xff]   ;;  %s4980_s22 = smov (!%p419_p3, %s3200_s22), 1 }
   0xc   : > { %3418 = vmatprep.subr.msk.bf16.mxu0 %vm545_vm0, %v3441_v0  ;;  %3419 = vmatprep.subr.msk.bf16.mxu1 %vm545_vm0, %v3441_v0  ;;  %v547_v2 = vsel %vm545_vm0, %v3441_v0, 0  ;;  %vm435_vm1 = vcmask 60416   ;;  %v710_v3 = vld [vmem:[%s4973_s11 + $0x10] sm:$0xff]  ;;  %v3443_v4 = vld [vmem:[%s4964_s2] sm:$0xff]   ;;  %v3481_v5 = vmov 0   ;;  %s3294_s15 = sshll.u32 %s4980_s22, 6 }
   0xd   : > { %3347 = vmatpush3.bf16.msra.mxu0 %v547_v2  ;;  %3415 = vmatpush3.bf16.msra.mxu1 %v547_v2  ;;  %437 = vst.msk [vmem:[#allocation2 + $0x4] sm:$0xf] %vm435_vm1, %v3481_v5  ;;  %438 = vst.msk [vmem:[#allocation2 + $0x8] sm:$0xf] %vm435_vm1, %v3481_v5  ;;  %v708_v6 = vld [vmem:[%s4973_s11] sm:$0xff]  ;;  %s3595_s18 = scalar_lea.vmem %s4962_s0, %s3294_s15  ;;  %vm520_vm2 = vcmask 293888   ;;  %s3632_s19 = scalar_lea.vmem %s4963_s1, %s3294_s15 }
   0xe   : > { %3348 = vmatprep.subr.bf16.mxu0 %v3442_v1  ;;  %3413 = vmatprep.subr.bf16.mxu1 %v3442_v1  ;;  %439 = vst.msk [vmem:[#allocation2 + $0xc] sm:$0xf] %vm435_vm1, %v3481_v5  ;;  %440 = vst.msk [vmem:[#allocation2 + $0x50] sm:$0xf] %vm435_vm1, %v3481_v5  ;;  %v711_v7 = vld [vmem:[%s4973_s11 + $0x18] sm:$0xff]  ;;  %v3444_v8 = vld [vmem:[%s3595_s18] sm:$0xff]  }
   0xf   : > { %441 = vst.msk [vmem:[#allocation2 + $0x54] sm:$0xf] %vm435_vm1, %v3481_v5  ;;  %442 = vst.msk [vmem:[#allocation2 + $0x58] sm:$0xf] %vm435_vm1, %v3481_v5  ;;  %3440 = vset.pattern.permute.xlu1 %v3481_v5  ;;  %3439 = vset.pattern.permute.xlu0 %v3481_v5  ;;  %v709_v9 = vld [vmem:[%s4973_s11 + $0x8] sm:$0xff]  ;;  %v3445_v10 = vld [vmem:[%s3595_s18 + $0x10] sm:$0xff]  }
  0x10   : > { %736 = vperm.xlu1 %3440, %v710_v3   ;;  %726 = vperm.xlu0 %3439, %v708_v6   ;;  %v3446_v11 = vld [vmem:[%s3595_s18 + $0x8] sm:$0xff]   ;;  %v3447_v12 = vld [vmem:[%s3595_s18 + $0x18] sm:$0xff]   ;;  %v3448_v13 = vld [vmem:[%s3595_s18 + $0x20] sm:$0xff]   ;;  %vm1214_vm3 = vsmask.f32 3328  ;;  %vm1180_vm8 = vcmask 126016  }
  0x11   : > { %3349 = vmatpush3.bf16.msra.mxu0 %v3442_v1  ;;  %3416 = vmatpush3.bf16.msra.mxu1 %v3442_v1  ;;  %v713_v14 = vld [vmem:[%s4973_s11 + $0x28] sm:$0xff]  ;;  %v712_v15 = vld [vmem:[%s4973_s11 + $0x20] sm:$0xff]  ;;  %v715_v16 = vld [vmem:[%s4973_s11 + $0x38] sm:$0xff]  ;;  %vm1215_vm4 = vsmask.f32 7440  ;;  %vm1429_vm10 = vcmask 191616  }
  0x12   : > { %3350 = vmatprep.subr.bf16.mxu0 %v3443_v4  ;;  %3414 = vmatprep.subr.bf16.mxu1 %v3443_v4  ;;  %v3449_v17 = vld [vmem:[%s3595_s18 + $0x28] sm:$0xff]   ;;  %v714_v18 = vld [vmem:[%s4973_s11 + $0x30] sm:$0xff]  ;;  %v716_v21 = vld [vmem:[%s4973_s11 + $0x40] sm:$0xff]  ;;  %vm917_vm6 = vsmask.f32 256  ;;  %vm2709_vm11 = vcmask 1043456  }
  0x13   : > { %3352 = vmatprep.mubr.msk.bf16.mxu0 %vm520_vm2, %v3444_v8  ;;  %3356 = vmatprep.mubr.msk.bf16.mxu1 %vm520_vm2, %v3445_v10  ;;  %v3450_v19 = vld [vmem:[%s3595_s18 + $0x30] sm:$0xff]   ;;  %v717_v20 = vld [vmem:[%s4973_s11 + $0x48] sm:$0xff]  ;;  %v719_v22 = vld [vmem:[%s4973_s11 + $0x58] sm:$0xff]  ;;  %vm918_vm7 = vsmask.f32 4368  ;;  %vm2913_vm12 = vcmask 31744  }
  0x14   : > { %741 = vperm.xlu1 %3440, %v711_v7   ;;  %731 = vperm.xlu0 %3439, %v709_v9   ;;  %v718_v23 = vld [vmem:[%s4973_s11 + $0x50] sm:$0xff]  ;;  %v3451_v24 = vld [vmem:[%s3595_s18 + $0x38] sm:$0xff]   ;;  %v721_v25 = vld [vmem:[%s4973_s11 + $0x68] sm:$0xff]  ;;  %vm1659_vm13 = vcmask 257216   ;;  %vm1756_vm14 = vcmask 322816   ;;  %vm2002_vm15 = vcmask 388416  }
  0x15   : > { %3351 = vmatpush3.bf16.msra.mxu0 %v3443_v4  ;;  %3417 = vmatpush3.bf16.msra.mxu1 %v3443_v4  ;;  %v720_v26 = vld [vmem:[%s4973_s11 + $0x60] sm:$0xff]  ;;  %v723_v27 = vld [vmem:[%s4973_s11 + $0x78] sm:$0xff]  ;;  %v722_v28 = vld [vmem:[%s4973_s11 + $0x70] sm:$0xff] }
  0x16   : > { %v1197_v29 = vld [vmem:[#allocation2 + $0x8] sm:$0xf]  ;;  %v1198_v34 = vld [vmem:[#allocation2 + $0xc] sm:$0xf]  ;;  %vm3665_vm5 = vmor %vm1214_vm3, %vm1215_vm4  ;;  %vm2684_vm3 = vcmask 588800   ;;  %vm3116_vm4 = vcmask 64512  }
  0x17   : > { %v1218_v30 = vshrl.u32 %v1197_v29, 16  ;;  %v1221_v31 = vshll.u32 %v1197_v29, 16  ;;  %v1100_v35 = vld [vmem:[#allocation2 + $0x8] sm:$0xf]  ;;  %v1227_v37 = vshll.u32 %v1198_v34, 16  ;;  %v1231_v42 = vshrl.u32 %v1198_v34, 16  ;;  %vm3724_vm9 = vmor %vm917_vm6, %vm918_vm7 }
  0x18   : > { %3353 = vmatmul.mubr.msk.bf16.vlgmr.msra.gmra.mxu0 %vm520_vm2, %v3446_v11  ;;  %3357 = vmatmul.mubr.msk.bf16.vlgmr.msra.gmra.mxu1 %vm520_vm2, %v3447_v12  ;;  %v1101_v43 = vld [vmem:[#allocation2 + $0xc] sm:$0xf]  ;;  %v900_v60 = vld [vmem:[#allocation2 + $0x4] sm:$0x8]  ;;  %v901_v61 = vld [vmem:[#allocation2 + $0x8] sm:$0xf] }
  0x19   : > { %3360 = vmatprep.mubr.msk.bf16.mxu1 %vm520_vm2, %v3448_v13  ;;  %751 = vperm.xlu1 %3440, %v713_v14   ;;  %v1220_v32 = vrot.slane %v1218_v30, 4  ;;  %v1223_v33 = vrot.slane %v1221_v31, 5  ;;  %v3663_v39 = vrot.slane %v1227_v37, 5  ;;  %v3674_v44 = vrot.slane %v1231_v42, 4  ;;  %v902_v1 = vld [vmem:[#allocation2 + $0xc] sm:$0xf] }
  0x1a   : > { %746 = vperm.xlu0 %3439, %v712_v15   ;;  %v921_v62 = vshrl.u32 %v900_v60, 16  ;;  %v926_v63 = vshrl.u32 %v901_v61, 16  ;;  %v929_v0 = vshll.u32 %v901_v61, 16  ;;  %v3705_v2 = vld [vmem:[%s4967_s5] ss:$0 sm:$0xff]  ;;  %v935_v9 = vshrl.u32 %v902_v1, 16 }
  0x1b   : > { %v1224_v36 = vor.u32 %v1223_v33, %v1220_v32  ;;  %v1234_v45 = vor.u32 %v3674_v44, %v3663_v39  ;;  %v3710_v3 = vld [vmem:[%s4968_s6] ss:$0 sm:$0xff] }
  0x1c   : > { %v3712_v5 = vrot.slane %v926_v63, 7  ;;  %v3248_v8 = vrot.slane %v921_v62, 11 }
  0x1d   : > { %761 = vperm.xlu1 %3440, %v715_v16   ;;  %v1225_v38 = vrot.slane %v1224_v36, 4 }
  0x1e   : > { %756 = vperm.xlu0 %3439, %v714_v18   ;;  %v931_v13 = vor.u32 %v929_v0, %v3712_v5 }
  0x1f   : > { %v1230_v41 = vsel %vm3665_vm5, %v1225_v38, %v3663_v39 }
  0x20   : > { %3361 = vmatmul.mubr.msk.bf16.gmra.mxu1 %vm520_vm2, %v3449_v17 }
  0x21   : > { %3364 = vmatprep.mubr.msk.bf16.mxu1 %vm520_vm2, %v3450_v19  ;;  %771 = vperm.xlu1 %3440, %v717_v20  }
  0x22   : > { %766 = vperm.xlu0 %3439, %v716_v21  }
  0x25   : > { %781 = vperm.xlu1 %3440, %v719_v22  }
  0x26   : > { %776 = vperm.xlu0 %3439, %v718_v23   ;;  %v932_v23 = vsel %vm3724_vm9, %v3248_v8, %v931_v13 }
  0x27   : > { %1084 = vst.msk [vmem:[#allocation3] sm:$0xf] %vm435_vm1, %v932_v23 }
  0x28   : > { %3365 = vmatmul.mubr.msk.bf16.gmra.mxu1 %vm520_vm2, %v3451_v24  ;;  %v3730_v24 = vrot.slane %v935_v9, 7  ;;  %vm2575_vm2 = vcmask 585216  }
  0x29   : > { %791 = vperm.xlu1 %3440, %v721_v25   ;;  %v938_v25 = vshll.u32 %v902_v1, 16 }
  0x2a   : > { %786 = vperm.xlu0 %3439, %v720_v26  }
  0x2b   : > { %v940_v36 = vor.u32 %v938_v25, %v3730_v24 }
  0x2d   : > { %801 = vperm.xlu1 %3440, %v723_v27  }
  0x2e   : > { %796 = vperm.xlu0 %3439, %v722_v28  }
  0x31   : > { %1134 = vrot.lane.b32.xlu1 %v1101_v43, %s3482_s23 }
  0x32   : > { %1132 = vrot.lane.b32.xlu0 %v1100_v35, %s3482_s23  ;;  %v933_v35 = vrot.slane %v3712_v5, 4 }
  0x34   : > { %v941_v23 = vsel %vm3724_vm9, %v933_v35, %v940_v36 }
  0x35   : > { %1085 = vst.msk [vmem:[#allocation3 + $0x4] sm:$0xf] %vm435_vm1, %v941_v23 }
  0x36   : > { %1381 = vrot.lane.b32.xlu0 %v1230_v41, %s3483_s24 }
  0x8b   : > { %v3678_v46 = vpop.permute.xlu0 %726  ;;  %v737_v48 = vpop.permute.xlu1 %736 }
  0x8f   : > { %v3680_v47 = vpop.permute.xlu0 %731  ;;  %v3684_v50 = vpop.permute.xlu1 %741 }
  0x94   : > { %v3686_v52 = vpop.permute.xlu1 %751 }
  0x95   : > { %v3682_v49 = vpop.permute.xlu0 %746 }
  0x98   : > { %v3690_v54 = vpop.permute.xlu1 %761 }
  0x99   : > { %v757_v51 = vpop.permute.xlu0 %756 }
  0x9c   : > { %v3694_v56 = vpop.permute.xlu1 %771 }
  0x9d   : > { %v3688_v53 = vpop.permute.xlu0 %766 }
  0xa0   : > { %v3698_v58 = vpop.permute.xlu1 %781 }
  0xa1   : > { %v3692_v55 = vpop.permute.xlu0 %776 }
  0xa4   : > { %v3716_v12 = vpop.permute.xlu1 %791 }
  0xa5   : > { %v3696_v57 = vpop.permute.xlu0 %786 }
  0xa8   : > { %v3743_v61 = vpop.permute.xlu1 %801 }
  0xa9   : > { %v3700_v59 = vpop.permute.xlu0 %796 }
  0xad   : > { %v1133_v4 = vpop.permute.xlu0 %1132 }
  0xae   : > { %1181 = vst.msk [vmem:[#allocation3] sm:$0xf] %vm1180_vm8, %v1133_v4 }
  0xb1   : > { %v1382_v30 = vpop.permute.xlu0 %1381 }
  0xb2   : > { %1430 = vst.msk [vmem:[#allocation3] sm:$0xf] %vm1429_vm10, %v1382_v30 }
  0xd8   : > { %v3354_v6 = vpop.f32.mrf.mxu0  ;;  %v3358_v7 = vpop.f32.mrf.mxu1 }
  0xd9   : > { %v655_v10 = vmul.f32 %v3354_v6, %v3705_v2  ;;  %v659_v11 = vmul.f32 %v3358_v7, %v3705_v2 }
  0xda   : > { %v583_v14 = vpop.f32.mrf.mxu0  ;;  %v599_v15 = vpop.f32.mrf.mxu1 }
  0xdb   : > { %v678_v16 = vadd.f32 %v3710_v3, %v655_v10  ;;  %v682_v17 = vadd.f32 %v3710_v3, %v659_v11  ;;  %v653_v18 = vmul.f32 %v3705_v2, %v583_v14  ;;  %v657_v19 = vmul.f32 %v3705_v2, %v599_v15 }
  0xdc   : > { %v3355_v21 = vpop.f32.mrf.mxu0  ;;  %v3359_v22 = vpop.f32.mrf.mxu1 }
  0xdd   : > { %v694_v26 = vmax.f32 %v678_v16, 0.0  ;;  %v698_v27 = vmax.f32 %v682_v17, 0.0  ;;  %v676_v28 = vadd.f32 %v3710_v3, %v653_v18  ;;  %v680_v29 = vadd.f32 %v3710_v3, %v657_v19  ;;  %v1135_v18 = vpop.permute.xlu1 %1134 }
  0xde   : > { %v656_v31 = vmul.f32 %v3355_v21, %v3705_v2  ;;  %v660_v32 = vmul.f32 %v3359_v22, %v3705_v2  ;;  %v586_v33 = vpop.f32.mrf.mxu0  ;;  %v602_v34 = vpop.f32.mrf.mxu1  ;;  %1182 = vst.msk [vmem:[#allocation3 + $0x4] sm:$0xf] %vm1180_vm8, %v1135_v18 }
  0xdf   : > { %v806_v37 = vmul.f32 %v737_v48, %v694_v26  ;;  %v810_v38 = vmul.f32 %v757_v51, %v698_v27  ;;  %v692_v41 = vmax.f32 %v676_v28, 0.0  ;;  %v696_v42 = vmax.f32 %v680_v29, 0.0 }
  0xe0   : > { %v679_v43 = vadd.f32 %v3710_v3, %v656_v31  ;;  %v683_v60 = vadd.f32 %v3710_v3, %v660_v32  ;;  %v654_v62 = vmul.f32 %v3705_v2, %v586_v33  ;;  %v658_v63 = vmul.f32 %v3705_v2, %v602_v34  ;;  %v3362_v0 = vpop.f32.mrf.mxu1 }
  0xe1   : > { %v3299_v1 = vpack.c.bf16 %v806_v37, %v806_v37  ;;  %v3303_v4 = vpack.c.bf16 %v810_v38, %v810_v38  ;;  %v804_v48 = vmul.f32 %v3678_v46, %v692_v41  ;;  %v808_v51 = vmul.f32 %v3682_v49, %v696_v42 }
  0xe2   : > { %v695_v5 = vmax.f32 %v679_v43, 0.0  ;;  %v699_v6 = vmax.f32 %v683_v60, 0.0  ;;  %v677_v7 = vadd.f32 %v3710_v3, %v654_v62  ;;  %v681_v8 = vadd.f32 %v3710_v3, %v658_v63  ;;  %v615_v9 = vpop.f32.mrf.mxu1 }
  0xe3   : > { %886 = vst.msk [vmem:[#allocation2 + $0x18] sm:$0xf] %vm435_vm1, %v3299_v1  ;;  %890 = vst.msk [vmem:[#allocation2 + $0x28] sm:$0xf] %vm435_vm1, %v3303_v4  ;;  %v3297_v10 = vpack.c.bf16 %v804_v48, %v804_v48  ;;  %v3301_v11 = vpack.c.bf16 %v808_v51, %v808_v51  ;;  %v663_v13 = vmul.f32 %v3362_v0, %v3705_v2 }
  0xe4   : > { %v661_v14 = vmul.f32 %v3705_v2, %v615_v9  ;;  %v807_v46 = vmul.f32 %v3684_v50, %v695_v5  ;;  %v811_v49 = vmul.f32 %v3690_v54, %v699_v6  ;;  %v693_v15 = vmax.f32 %v677_v7, 0.0  ;;  %v3363_v17 = vpop.f32.mrf.mxu1 }
  0xe5   : > { %v697_v16 = vmax.f32 %v681_v8, 0.0  ;;  %884 = vst.msk [vmem:[#allocation2 + $0x10] sm:$0xf] %vm435_vm1, %v3297_v10  ;;  %888 = vst.msk [vmem:[#allocation2 + $0x20] sm:$0xf] %vm435_vm1, %v3301_v11  ;;  %v686_v19 = vadd.f32 %v3710_v3, %v663_v13  ;;  %v664_v22 = vmul.f32 %v3363_v17, %v3705_v2 }
  0xe6   : > { %v684_v21 = vadd.f32 %v3710_v3, %v661_v14  ;;  %v3300_v50 = vpack.c.bf16 %v807_v46, %v807_v46  ;;  %v3304_v25 = vpack.c.bf16 %v811_v49, %v811_v49  ;;  %v805_v54 = vmul.f32 %v3680_v47, %v693_v15  ;;  %v618_v27 = vpop.f32.mrf.mxu1 }
  0xe7   : > { %v809_v26 = vmul.f32 %v3686_v52, %v697_v16  ;;  %v702_v28 = vmax.f32 %v686_v19, 0.0  ;;  %v687_v30 = vadd.f32 %v3710_v3, %v664_v22  ;;  %v662_v31 = vmul.f32 %v3705_v2, %v618_v27 }
  0xe8   : > { %v700_v29 = vmax.f32 %v684_v21, 0.0  ;;  %887 = vst.msk [vmem:[#allocation2 + $0x1c] sm:$0xf] %vm435_vm1, %v3300_v50  ;;  %891 = vst.msk [vmem:[#allocation2 + $0x2c] sm:$0xf] %vm435_vm1, %v3304_v25  ;;  %v3298_v32 = vpack.c.bf16 %v805_v54, %v805_v54  ;;  %v3366_v47 = vpop.f32.mrf.mxu1 }
  0xe9   : > { %v3302_v33 = vpack.c.bf16 %v809_v26, %v809_v26  ;;  %v814_v52 = vmul.f32 %v3692_v55, %v702_v28  ;;  %v703_v35 = vmax.f32 %v687_v30, 0.0  ;;  %v685_v36 = vadd.f32 %v3710_v3, %v662_v31 }
  0xea   : > { %v812_v34 = vmul.f32 %v3688_v53, %v700_v29  ;;  %885 = vst.msk [vmem:[#allocation2 + $0x14] sm:$0xf] %vm435_vm1, %v3298_v32  ;;  %v667_v37 = vmul.f32 %v3366_v47, %v3705_v2  ;;  %v631_v38 = vpop.f32.mrf.mxu1  ;;  %v1678_v41 = vld [vmem:[#allocation2 + $0x18] sm:$0xf]  ;;  %v2253_v19 = vld [vmem:[#allocation2 + $0x28] sm:$0xf] }
  0xeb   : > { %889 = vst.msk [vmem:[#allocation2 + $0x24] sm:$0xf] %vm435_vm1, %v3302_v33  ;;  %v3307_v42 = vpack.c.bf16 %v814_v52, %v814_v52  ;;  %v815_v60 = vmul.f32 %v3698_v58, %v703_v35  ;;  %v701_v62 = vmax.f32 %v685_v36, 0.0  ;;  %1712 = vrot.lane.b32.xlu0 %v1678_v41, %s3484_s28  ;;  %v665_v55 = vmul.f32 %v3705_v2, %v631_v38  ;;  %v2249_v5 = vld [vmem:[#allocation2 + $0x18] sm:$0xf] }
  0xec   : > { %v3305_v43 = vpack.c.bf16 %v812_v34, %v812_v34  ;;  %v690_v53 = vadd.f32 %v3710_v3, %v667_v37  ;;  %v3367_v63 = vpop.f32.mrf.mxu1  ;;  %v1104_v49 = vld [vmem:[#allocation2 + $0x18] sm:$0xf]  ;;  %v1102_v23 = vld [vmem:[#allocation2 + $0x10] sm:$0xf]  ;;  %v2251_v26 = vld [vmem:[#allocation2 + $0x20] sm:$0xf] }
  0xed   : > { %894 = vst.msk [vmem:[#allocation2 + $0x38] sm:$0xf] %vm435_vm1, %v3307_v42  ;;  %v3308_v0 = vpack.c.bf16 %v815_v60, %v815_v60  ;;  %v813_v1 = vmul.f32 %v3694_v56, %v701_v62  ;;  %v668_v4 = vmul.f32 %v3367_v63, %v3705_v2  ;;  %v688_v58 = vadd.f32 %v3710_v3, %v665_v55  ;;  %v1676_v25 = vld [vmem:[#allocation2 + $0x10] sm:$0xf]  ;;  %v1106_v28 = vld [vmem:[#allocation2 + $0x20] sm:$0xf] }
  0xee   : > { %892 = vst.msk [vmem:[#allocation2 + $0x30] sm:$0xf] %vm435_vm1, %v3305_v43  ;;  %v706_v48 = vmax.f32 %v690_v53, 0.0  ;;  %v634_v51 = vpop.f32.mrf.mxu1  ;;  %v3816_v29 = vld [vmem:[#allocation2 + $0x10] sm:$0xf]  ;;  %v1235_v62 = vrot.slane %v1234_v45, 4 }
  0xef   : > { %895 = vst.msk [vmem:[#allocation2 + $0x3c] sm:$0xf] %vm435_vm1, %v3308_v0  ;;  %v3306_v6 = vpack.c.bf16 %v813_v1, %v813_v1  ;;  %v691_v7 = vadd.f32 %v3710_v3, %v668_v4  ;;  %v666_v8 = vmul.f32 %v3705_v2, %v634_v51  ;;  %2281 = vrot.lane.b32.xlu0 %v2249_v5, %s3485_s29  ;;  %v1679_v9 = vld [vmem:[#allocation2 + $0x1c] sm:$0xf]  ;;  %v704_v10 = vmax.f32 %v688_v58, 0.0 }
  0xf0   : > { %v818_v56 = vmul.f32 %v3700_v59, %v706_v48  ;;  %1714 = vrot.lane.b32.xlu1 %v1679_v9, %s3484_s28  ;;  %v2250_v16 = vld [vmem:[#allocation2 + $0x1c] sm:$0xf]  ;;  %v1683_v21 = vld [vmem:[#allocation2 + $0x2c] sm:$0xf]  ;;  %v1447_v32 = vld [vmem:[#allocation2 + $0x10] sm:$0xf] }
  0xf1   : > { %893 = vst.msk [vmem:[#allocation2 + $0x34] sm:$0xf] %vm435_vm1, %v3306_v6  ;;  %v707_v11 = vmax.f32 %v691_v7, 0.0  ;;  %v689_v13 = vadd.f32 %v3710_v3, %v666_v8  ;;  %v816_v46 = vmul.f32 %v3696_v57, %v704_v10  ;;  %v1682_v3 = vld [vmem:[#allocation2 + $0x28] sm:$0xf]  ;;  %v1237_v52 = vshll.u32 %v3816_v29, 16 }
  0xf2   : > { %v3311_v14 = vpack.c.bf16 %v818_v56, %v818_v56  ;;  %v2254_v22 = vld [vmem:[#allocation2 + $0x2c] sm:$0xf]  ;;  %v1103_v54 = vld [vmem:[#allocation2 + $0x14] sm:$0xf]  ;;  %v2252_v30 = vld [vmem:[#allocation2 + $0x24] sm:$0xf] }
  0xf3   : > { %v819_v2 = vmul.f32 %v3743_v61, %v707_v11  ;;  %v705_v15 = vmax.f32 %v689_v13, 0.0  ;;  %1140 = vrot.lane.b32.xlu0 %v1104_v49, %s3482_s23  ;;  %v3309_v59 = vpack.c.bf16 %v816_v46, %v816_v46  ;;  %v1105_v61 = vld [vmem:[#allocation2 + $0x1c] sm:$0xf]  ;;  %v1109_v50 = vld [vmem:[#allocation2 + $0x2c] sm:$0xf]  ;;  %v1469_v41 = vshrl.u32 %v1447_v32, 16 }
  0xf4   : > { %898 = vst.msk [vmem:[#allocation2 + $0x48] sm:$0xf] %vm435_vm1, %v3311_v14  ;;  %2283 = vrot.lane.b32.xlu1 %v2250_v16, %s3485_s29  ;;  %v1677_v27 = vld [vmem:[#allocation2 + $0x14] sm:$0xf]  ;;  %v1450_v31 = vld [vmem:[#allocation2 + $0x1c] sm:$0xf] }
  0xf5   : > { %v3312_v17 = vpack.c.bf16 %v819_v2, %v819_v2  ;;  %v817_v18 = vmul.f32 %v3716_v12, %v705_v15  ;;  %896 = vst.msk [vmem:[#allocation2 + $0x40] sm:$0xf] %vm435_vm1, %v3309_v59  ;;  %v1108_v12 = vld [vmem:[#allocation2 + $0x28] sm:$0xf]  ;;  %v3820_v33 = vld [vmem:[#allocation2 + $0x18] sm:$0xf] }
  0xf6   : > { %v3822_v47 = vld [vmem:[#allocation2 + $0x18] sm:$0xf]  ;;  %v2021_v34 = vld [vmem:[#allocation2 + $0x1c] sm:$0xf]  ;;  %v1680_v36 = vld [vmem:[#allocation2 + $0x20] sm:$0xf] }
  0xf7   : > { %899 = vst.msk [vmem:[#allocation2 + $0x4c] sm:$0xf] %vm435_vm1, %v3312_v17  ;;  %v3310_v57 = vpack.c.bf16 %v817_v18, %v817_v18  ;;  %1720 = vrot.lane.b32.xlu0 %v1682_v3, %s3484_s28  ;;  %v1775_v35 = vld [vmem:[#allocation2 + $0x18] sm:$0xf]  ;;  %v1496_v37 = vshrl.u32 %v1450_v31, 16  ;;  %v1487_v43 = vshrl.u32 %v3820_v33, 16 }
  0xf8   : > { %1142 = vrot.lane.b32.xlu1 %v1105_v61, %s3482_s23  ;;  %v1446_v38 = vld [vmem:[#allocation2 + $0xc] sm:$0x8]  ;;  %v1107_v42 = vld [vmem:[#allocation2 + $0x24] sm:$0xf]  ;;  %v2042_v60 = vshrl.u32 %v3822_v47, 16  ;;  %v2051_v53 = vshrl.u32 %v2021_v34, 16 }
  0xf9   : > { %897 = vst.msk [vmem:[#allocation2 + $0x44] sm:$0xf] %vm435_vm1, %v3310_v57  ;;  %v1810_v55 = vshll.u32 %v1775_v35, 16  ;;  %v1814_v63 = vshrl.u32 %v1775_v35, 16  ;;  %v1686_v0 = vld [vmem:[#allocation2 + $0x38] sm:$0xf] }
  0xfa   : > { %v1681_v1 = vld [vmem:[#allocation2 + $0x24] sm:$0xf]  ;;  %v3832_v4 = vrot.slane %v1237_v52, 5  ;;  %v1464_v48 = vshrl.u32 %v1446_v38, 16  ;;  %v3834_v58 = vld [vmem:[#allocation2 + $0x28] sm:$0xf] }
  0xfb   : > { %2289 = vrot.lane.b32.xlu0 %v2253_v19, %s3485_s29  ;;  %v3836_v51 = vrot.slane %v1496_v37, 7  ;;  %v1499_v5 = vshll.u32 %v1450_v31, 16  ;;  %v3838_v6 = vrot.slane %v1469_v41, 7  ;;  %v1472_v7 = vshll.u32 %v1447_v32, 16  ;;  %v2346_v8 = vld [vmem:[#allocation2 + $0x18] sm:$0xf] }
  0xfc   : > { %1722 = vrot.lane.b32.xlu1 %v1683_v21, %s3484_s28  ;;  %v3841_v39 = vrot.slane %v1487_v43, 7  ;;  %v3843_v44 = vrot.slane %v2042_v60, 7  ;;  %v3845_v45 = vld [vmem:[#allocation2 + $0x1c] sm:$0xf]  ;;  %v1454_v9 = vld [vmem:[#allocation2 + $0x2c] sm:$0xf]  ;;  %v1240_v49 = vsel %vm3665_vm5, %v1235_v62, %v3832_v4 }
  0xfd   : > { %v3848_v56 = vrot.slane %v2051_v53, 7  ;;  %v3850_v10 = vrot.slane %v1810_v55, 5  ;;  %v1816_v11 = vrot.slane %v1814_v63, 4  ;;  %v1523_v13 = vshrl.u32 %v3834_v58, 16  ;;  %v1201_v14 = vld [vmem:[#allocation2 + $0x18] sm:$0xf] }
  0xfe   : > { %v2257_v46 = vld [vmem:[#allocation2 + $0x38] sm:$0xf]  ;;  %v3249_v2 = vrot.slane %v1464_v48, 11  ;;  %v2364_v15 = vshrl.u32 %v2346_v8, 16  ;;  %v2367_v16 = vshll.u32 %v2346_v8, 16  ;;  %v1501_v59 = vor.u32 %v1499_v5, %v3836_v51 }
  0xff   : > { %1148 = vrot.lane.b32.xlu0 %v1108_v12, %s3482_s23  ;;  %v1474_v17 = vor.u32 %v1472_v7, %v3838_v6  ;;  %v2054_v18 = vshll.u32 %v2021_v34, 16  ;;  %v1532_v3 = vshrl.u32 %v1454_v9, 16  ;;  %v3858_v57 = vld [vmem:[#allocation2 + $0x28] sm:$0xf]  ;;  %v2025_v61 = vld [vmem:[#allocation2 + $0x2c] sm:$0xf] }
 0x100   : > { %2291 = vrot.lane.b32.xlu1 %v2254_v22, %s3485_s29  ;;  %v1494_v19 = vrot.slane %v3841_v39, 4  ;;  %v1820_v21 = vshll.u32 %v3845_v45, 16  ;;  %v3863_v12 = vld [vmem:[#allocation2 + $0x1c] sm:$0xf]  ;;  %v1257_v22 = vshll.u32 %v1201_v14, 16  ;;  %v2078_v31 = vshrl.u32 %v3858_v57, 16 }
 0x101   : > { %v2087_v32 = vshrl.u32 %v2025_v61, 16  ;;  %v1112_v52 = vld [vmem:[#allocation2 + $0x38] sm:$0xf]  ;;  %v1475_v35 = vsel %vm3724_vm9, %v3249_v2, %v1474_v17  ;;  %v2373_v37 = vshll.u32 %v3863_v12, 16  ;;  %v3880_v38 = vld [vmem:[#allocation2 + $0x1c] sm:$0xf] }
 0x102   : > { %v1502_v34 = vsel %vm3724_vm9, %v1494_v19, %v1501_v59  ;;  %v3882_v41 = vrot.slane %v1257_v22, 5  ;;  %v3885_v53 = vrot.slane %v1820_v21, 5  ;;  %v1535_v63 = vshll.u32 %v1454_v9, 16  ;;  %v2350_v8 = vld [vmem:[#allocation2 + $0x28] sm:$0xf] }
 0x103   : > { %1136 = vrot.lane.b32.xlu0 %v1102_v23, %s3482_s23  ;;  %v1261_v23 = vshrl.u32 %v1201_v14, 16  ;;  %v3892_v5 = vrot.slane %v2078_v31, 7  ;;  %v3894_v7 = vrot.slane %v2087_v32, 7  ;;  %v3897_v14 = vrot.slane %v2373_v37, 5  ;;  %v3902_v2 = vld [vmem:[#allocation2 + $0x2c] sm:$0xf] }
 0x104   : > { %1150 = vrot.lane.b32.xlu1 %v1109_v50, %s3482_s23  ;;  %v2049_v50 = vrot.slane %v3843_v44, 4 }
 0x105   : > { %v2085_v21 = vrot.slane %v3892_v5, 4 }
 0x107   : > { %1708 = vrot.lane.b32.xlu0 %v1676_v25, %s3484_s28  ;;  %v2056_v25 = vor.u32 %v2054_v18, %v3848_v56  ;;  %v2403_v18 = vshll.u32 %v2350_v8, 16 }
 0x108   : > { %1138 = vrot.lane.b32.xlu1 %v1103_v54, %s3482_s23  ;;  %v1817_v54 = vor.u32 %v1816_v11, %v3850_v10  ;;  %v905_v11 = vld [vmem:[#allocation2 + $0x18] sm:$0xf] }
 0x109   : > { %v3926_v37 = vrot.slane %v2403_v18, 5 }
 0x10a   : > { %v1818_v62 = vrot.slane %v1817_v54, 4  ;;  %v1860_v54 = vshll.u32 %v3902_v2, 16 }
 0x10b   : > { %2285 = vrot.lane.b32.xlu0 %v2251_v26, %s3485_s29  ;;  %v3869_v26 = vrot.slane %v1523_v13, 7 }
 0x10c   : > { %1710 = vrot.lane.b32.xlu1 %v1677_v27, %s3484_s28  ;;  %v1779_v27 = vld [vmem:[#allocation2 + $0x28] sm:$0xf]  ;;  %v1823_v17 = vsel %vm3665_vm5, %v1818_v62, %v3885_v53  ;;  %v1824_v62 = vshrl.u32 %v3845_v45, 16 }
 0x10d   : > { %v1850_v43 = vshll.u32 %v1779_v27, 16  ;;  %v1854_v60 = vshrl.u32 %v1779_v27, 16  ;;  %v1530_v55 = vrot.slane %v3869_v26, 4 }
 0x10f   : > { %1144 = vrot.lane.b32.xlu0 %v1106_v28, %s3482_s23  ;;  %v2366_v28 = vrot.slane %v2364_v15, 4  ;;  %v3904_v15 = vrot.slane %v1850_v43, 5 }
 0x110   : > { %2287 = vrot.lane.b32.xlu1 %v2252_v30, %s3485_s29  ;;  %v2369_v30 = vrot.slane %v2367_v16, 5  ;;  %v1856_v16 = vrot.slane %v1854_v60, 4 }
 0x112   : > { %v2370_v48 = vor.u32 %v2369_v30, %v2366_v28  ;;  %v965_v28 = vshll.u32 %v905_v11, 16  ;;  %v906_v30 = vld [vmem:[#allocation2 + $0x1c] sm:$0xf] }
 0x113   : > { %1716 = vrot.lane.b32.xlu0 %v1680_v36, %s3484_s28  ;;  %v3876_v36 = vrot.slane %v1532_v3, 7  ;;  %v2407_v3 = vshrl.u32 %v2350_v8, 16  ;;  %v3936_v8 = vrot.slane %v1860_v54, 5 }
 0x114   : > { %1146 = vrot.lane.b32.xlu1 %v1107_v42, %s3482_s23  ;;  %v1263_v42 = vrot.slane %v1261_v23, 4  ;;  %v2371_v19 = vrot.slane %v2370_v48, 4  ;;  %v1205_v23 = vld [vmem:[#allocation2 + $0x28] sm:$0xf]  ;;  %v971_v48 = vshrl.u32 %v906_v30, 16 }
 0x115   : > { %v1537_v13 = vor.u32 %v1535_v63, %v3876_v36  ;;  %v1297_v43 = vshll.u32 %v1205_v23, 16 }
 0x116   : > { %v1264_v9 = vor.u32 %v1263_v42, %v3882_v41  ;;  %v2409_v42 = vrot.slane %v2407_v3, 4 }
 0x117   : > { %1728 = vrot.lane.b32.xlu0 %v1686_v0, %s3484_s28  ;;  %v3888_v0 = vld [vmem:[#allocation2 + $0x14] sm:$0xf] }
 0x118   : > { %1718 = vrot.lane.b32.xlu1 %v1681_v1, %s3484_s28  ;;  %v2057_v1 = vsel %vm3724_vm9, %v2049_v50, %v2056_v25  ;;  %v953_v59 = vshrl.u32 %v3888_v0, 16  ;;  %v1538_v25 = vsel %vm3724_vm9, %v1530_v55, %v1537_v13  ;;  %v1265_v31 = vrot.slane %v1264_v9, 4 }
 0x119   : > { %v2376_v55 = vsel %vm3665_vm5, %v2371_v19, %v3897_v14  ;;  %v1301_v13 = vshrl.u32 %v1205_v23, 16  ;;  %v3948_v9 = vrot.slane %v971_v48, 7  ;;  %v2410_v3 = vor.u32 %v2409_v42, %v3926_v37 }
 0x11a   : > { %v3913_v50 = vrot.slane %v953_v59, 7  ;;  %v1490_v59 = vshll.u32 %v3820_v33, 16  ;;  %v1526_v19 = vshll.u32 %v3834_v58, 16  ;;  %v1687_v58 = vld [vmem:[#allocation2 + $0x3c] sm:$0xf]  ;;  %v2081_v48 = vshll.u32 %v3858_v57, 16 }
 0x11b   : > { %2297 = vrot.lane.b32.xlu0 %v2257_v46, %s3485_s29  ;;  %v2090_v46 = vshll.u32 %v2025_v61, 16  ;;  %v962_v61 = vshrl.u32 %v905_v11, 16  ;;  %v1303_v54 = vrot.slane %v1301_v13, 4  ;;  %v2411_v13 = vrot.slane %v2410_v3, 4 }
 0x11c   : > { %1383 = vrot.lane.b32.xlu1 %v1240_v49, %s3483_s24  ;;  %v1267_v49 = vshll.u32 %v3880_v38, 16  ;;  %v2377_v57 = vshrl.u32 %v3863_v12, 16 }
 0x11d   : > { %v2092_v22 = vor.u32 %v2090_v46, %v3894_v7  ;;  %v964_v27 = vrot.slane %v962_v61, 7  ;;  %v3953_v61 = vrot.slane %v1297_v43, 5  ;;  %v903_v43 = vld [vmem:[#allocation2 + $0x10] sm:$0xf] }
 0x11e   : > { %v3919_v32 = vrot.slane %v1267_v49, 5  ;;  %v3941_v49 = vld [vmem:[#allocation2 + $0x24] sm:$0xf] }
 0x11f   : > { %1156 = vrot.lane.b32.xlu0 %v1112_v52, %s3482_s23  ;;  %v1857_v52 = vor.u32 %v1856_v16, %v3904_v15  ;;  %v967_v60 = vor.u32 %v965_v28, %v964_v27  ;;  %v2093_v63 = vsel %vm3724_vm9, %v2085_v21, %v2092_v22  ;;  %v974_v16 = vshll.u32 %v906_v30, 16  ;;  %v3956_v21 = vld [vmem:[#allocation2 + $0x2c] sm:$0xf] }
 0x120   : > { %1617 = vrot.lane.b32.xlu1 %v1502_v34, %s3486_s30  ;;  %v3922_v34 = vld [vmem:[#allocation2 + $0x2c] sm:$0xf]  ;;  %v1270_v45 = vsel %vm3665_vm5, %v1265_v31, %v3919_v32  ;;  %v969_v22 = vrot.slane %v964_v27, 4  ;;  %v989_v33 = vshrl.u32 %v3941_v49, 16  ;;  %v3965_v30 = vor.u32 %v1526_v19, %v3869_v26 }
 0x121   : > { %v2413_v11 = vshll.u32 %v3922_v34, 16  ;;  %v1858_v18 = vrot.slane %v1857_v52, 4  ;;  %v976_v23 = vor.u32 %v974_v16, %v3948_v9  ;;  %v910_v16 = vld [vmem:[#allocation2 + $0x2c] sm:$0xf]  ;;  %v3989_v19 = vor.u32 %v2081_v48, %v3892_v5  ;;  %v4002_v5 = vld [vmem:[#allocation2 + $0x20] sm:$0xf] }
 0x122   : > { %v3970_v52 = vrot.slane %v989_v33, 7  ;;  %v1007_v12 = vshrl.u32 %v910_v16, 16 }
 0x123   : > { %1611 = vrot.lane.b32.xlu0 %v1475_v35, %s3486_s30  ;;  %v960_v35 = vrot.slane %v3913_v50, 4  ;;  %v977_v27 = vsel %vm3724_vm9, %v969_v22, %v976_v23  ;;  %v3997_v23 = vld [vmem:[#allocation2 + $0x20] sm:$0xf] }
 0x124   : > { %2186 = vrot.lane.b32.xlu1 %v2057_v1, %s3487_s13  ;;  %v3934_v1 = vld [vmem:[#allocation2 + $0x14] sm:$0xf]  ;;  %1089 = vst.msk [vmem:[#allocation3 + $0x14] sm:$0xf] %vm435_vm1, %v977_v27  ;;  %v1830_v48 = vshll.u32 %v3997_v23, 16 }
 0x125   : > { %v968_v46 = vsel %vm3724_vm9, %v960_v35, %v967_v60  ;;  %v1478_v28 = vshrl.u32 %v3934_v1, 16  ;;  %v1307_v35 = vshll.u32 %v3956_v21, 16  ;;  %v1863_v60 = vsel %vm3665_vm5, %v1858_v18, %v3936_v8 }
 0x126   : > { %1088 = vst.msk [vmem:[#allocation3 + $0x10] sm:$0xf] %vm435_vm1, %v968_v46  ;;  %v944_v18 = vshrl.u32 %v903_v43, 16  ;;  %v1481_v22 = vshll.u32 %v3934_v1, 16 }
 0x127   : > { %1958 = vrot.lane.b32.xlu0 %v1823_v17, %s3488_s14  ;;  %v909_v17 = vld [vmem:[#allocation2 + $0x28] sm:$0xf]  ;;  %v3983_v46 = vrot.slane %v1478_v28, 7  ;;  %v3994_v3 = vrot.slane %v1307_v35, 5  ;;  %v947_v28 = vshll.u32 %v903_v43, 16  ;;  %v1241_v43 = vshrl.u32 %v3816_v29, 16 }
 0x128   : > { %1625 = vrot.lane.b32.xlu1 %v1538_v25, %s3486_s30  ;;  %v3960_v25 = vor.u32 %v1490_v59, %v3841_v39  ;;  %v998_v31 = vshrl.u32 %v909_v17, 16  ;;  %v3973_v39 = vrot.slane %v2413_v11, 5  ;;  %v1001_v26 = vshll.u32 %v909_v17, 16  ;;  %v2258_v59 = vld [vmem:[#allocation2 + $0x3c] sm:$0xf] }
 0x129   : > { %v1304_v11 = vor.u32 %v1303_v54, %v3953_v61  ;;  %v3986_v17 = vld [vmem:[#allocation2 + $0x24] sm:$0xf]  ;;  %v1483_v1 = vor.u32 %v1481_v22, %v3983_v46  ;;  %v1113_v35 = vld [vmem:[#allocation2 + $0x3c] sm:$0xf]  ;;  %v1773_v22 = vld [vmem:[#allocation2 + $0x10] sm:$0xf] }
 0x12a   : > { %v1000_v42 = vrot.slane %v998_v31, 7  ;;  %v2416_v31 = vsel %vm3665_vm5, %v2411_v13, %v3973_v39  ;;  %v2069_v27 = vshrl.u32 %v3986_v17, 16  ;;  %v2060_v13 = vshrl.u32 %v4002_v5, 16 }
 0x12b   : > { %2527 = vrot.lane.b32.xlu0 %v2376_v55, %s3489_s16  ;;  %v1826_v55 = vrot.slane %v1824_v62, 4  ;;  %v942_v62 = vrot.slane %v3730_v24, 4  ;;  %v946_v24 = vrot.slane %v944_v18, 7 }
 0x12c   : > { %2194 = vrot.lane.b32.xlu1 %v2093_v63, %s3487_s13  ;;  %v996_v63 = vrot.slane %v3970_v52, 4  ;;  %v4028_v18 = vrot.slane %v2069_v27, 7  ;;  %v2255_v27 = vld [vmem:[#allocation2 + $0x30] sm:$0xf] }
 0x12d   : > { %v1827_v54 = vor.u32 %v1826_v55, %v3885_v53  ;;  %v949_v53 = vor.u32 %v947_v28, %v946_v24  ;;  %v1010_v55 = vshll.u32 %v910_v16, 16  ;;  %v4036_v28 = vrot.slane %v1830_v48, 5  ;;  %v1452_v48 = vld [vmem:[#allocation2 + $0x24] sm:$0xf] }
 0x12f   : > { %1389 = vrot.lane.b32.xlu0 %v1270_v45, %s3483_s24  ;;  %v1003_v45 = vor.u32 %v1001_v26, %v1000_v42  ;;  %v1005_v26 = vrot.slane %v1000_v42, 4  ;;  %v1828_v16 = vrot.slane %v1827_v54, 4  ;;  %v4040_v54 = vld [vmem:[#allocation2 + $0x20] sm:$0xf] }
 0x130   : > { %1730 = vrot.lane.b32.xlu1 %v1687_v58, %s3484_s28  ;;  %v1305_v58 = vrot.slane %v1304_v11, 4  ;;  %v1271_v11 = vshrl.u32 %v3880_v38, 16  ;;  %v2379_v38 = vrot.slane %v2377_v57, 4  ;;  %v1791_v57 = vshrl.u32 %v1773_v22, 16 }
 0x131   : > { %v1004_v33 = vsel %vm3724_vm9, %v996_v63, %v1003_v45  ;;  %v1476_v63 = vrot.slane %v3838_v6, 4  ;;  %v950_v45 = vsel %vm3724_vm9, %v942_v62, %v949_v53  ;;  %v1794_v53 = vshll.u32 %v1773_v22, 16  ;;  %v4062_v22 = vld [vmem:[#allocation2 + $0x20] sm:$0xf] }
 0x132   : > { %1092 = vst.msk [vmem:[#allocation3 + $0x20] sm:$0xf] %vm435_vm1, %v1004_v33  ;;  %v1310_v29 = vsel %vm3665_vm5, %v1305_v58, %v3994_v3  ;;  %1086 = vst.msk [vmem:[#allocation3 + $0x8] sm:$0xf] %vm435_vm1, %v950_v45  ;;  %v1243_v58 = vrot.slane %v1241_v43, 4  ;;  %v1273_v43 = vrot.slane %v1271_v11, 4 }
 0x133   : > { %1966 = vrot.lane.b32.xlu0 %v1863_v60, %s3488_s14  ;;  %v4011_v60 = vrot.slane %v1007_v12, 7  ;;  %v1484_v6 = vsel %vm3724_vm9, %v1476_v63, %v1483_v1  ;;  %v4038_v12 = vrot.slane %v2060_v13, 7  ;;  %v2383_v63 = vshll.u32 %v4040_v54, 16  ;;  %v1110_v45 = vld [vmem:[#allocation2 + $0x30] sm:$0xf] }
 0x134   : > { %2299 = vrot.lane.b32.xlu1 %v2258_v59, %s3485_s29  ;;  %v956_v59 = vshll.u32 %v3888_v0, 16  ;;  %v951_v0 = vrot.slane %v946_v24, 4  ;;  %v907_v24 = vld [vmem:[#allocation2 + $0x20] sm:$0xf]  ;;  %v978_v11 = vrot.slane %v3948_v9, 4 }
 0x135   : > { %v1012_v42 = vor.u32 %v1010_v55, %v4011_v60  ;;  %v2380_v55 = vor.u32 %v2379_v38, %v3897_v14  ;;  %v980_v13 = vshrl.u32 %v907_v24, 16  ;;  %v983_v14 = vshll.u32 %v907_v24, 16 }
 0x136   : > { %v958_v33 = vor.u32 %v956_v59, %v3913_v50  ;;  %v1833_v50 = vsel %vm3665_vm5, %v1828_v16, %v4036_v28  ;;  %v1796_v16 = vrot.slane %v1794_v53, 5 }
 0x137   : > { %2535 = vrot.lane.b32.xlu0 %v2416_v31, %s3489_s16  ;;  %v1013_v62 = vsel %vm3724_vm9, %v1005_v26, %v1012_v42  ;;  %v2072_v31 = vshll.u32 %v3986_v17, 16  ;;  %v2067_v17 = vrot.slane %v4038_v12, 4  ;;  %v1244_v42 = vor.u32 %v1243_v58, %v3832_v4 }
 0x138   : > { %1158 = vrot.lane.b32.xlu1 %v1113_v35, %s3482_s23  ;;  %1093 = vst.msk [vmem:[#allocation3 + $0x24] sm:$0xf] %vm435_vm1, %v1013_v62  ;;  %v959_v1 = vsel %vm3724_vm9, %v951_v0, %v958_v33  ;;  %v4049_v35 = vld [vmem:[#allocation2 + $0x14] sm:$0xf]  ;;  %v982_v62 = vrot.slane %v980_v13, 7  ;;  %v2381_v0 = vrot.slane %v2380_v55, 4  ;;  %v1274_v4 = vor.u32 %v1273_v43, %v3919_v32 }
 0x139   : > { %1087 = vst.msk [vmem:[#allocation3 + $0xc] sm:$0xf] %vm435_vm1, %v959_v1  ;;  %v2074_v26 = vor.u32 %v2072_v31, %v4028_v18  ;;  %v1247_v59 = vshll.u32 %v4049_v35, 16  ;;  %v4069_v33 = vld [vmem:[#allocation2 + $0x14] sm:$0xf]  ;;  %v1514_v31 = vshrl.u32 %v1452_v48, 16 }
 0x13a   : > { %v4072_v58 = vrot.slane %v2383_v63, 5  ;;  %v1245_v1 = vrot.slane %v1244_v42, 4  ;;  %v1275_v55 = vrot.slane %v1274_v4, 4  ;;  %v2019_v63 = vld [vmem:[#allocation2 + $0x14] sm:$0x8]  ;;  %v2387_v13 = vshrl.u32 %v4040_v54, 16 }
 0x13b   : > { %1397 = vrot.lane.b32.xlu0 %v1310_v29, %s3483_s24  ;;  %v4060_v29 = vld [vmem:[#allocation2 + $0x20] sm:$0xf]  ;;  %v2075_v38 = vsel %vm3724_vm9, %v2067_v17, %v2074_v26  ;;  %v4074_v24 = vrot.slane %v1247_v59, 5  ;;  %v1800_v17 = vshll.u32 %v4069_v33, 16  ;;  %v4085_v43 = vrot.slane %v1514_v31, 7 }
 0x13c   : > { %1613 = vrot.lane.b32.xlu1 %v1484_v6, %s3486_s30  ;;  %v1793_v6 = vrot.slane %v1791_v57, 4  ;;  %v985_v57 = vor.u32 %v983_v14, %v982_v62  ;;  %v1277_v9 = vshll.u32 %v4060_v29, 16  ;;  %v2386_v26 = vsel %vm3665_vm5, %v2381_v0, %v4072_v58 }
 0x13d   : > { %v992_v42 = vshll.u32 %v3941_v49, 16  ;;  %v1250_v59 = vsel %vm3665_vm5, %v1245_v1, %v4074_v24  ;;  %v1517_v14 = vshll.u32 %v1452_v48, 16  ;;  %v2037_v0 = vshrl.u32 %v2019_v63, 16 }
 0x13e   : > { %v1797_v53 = vor.u32 %v1796_v16, %v1793_v6  ;;  %v986_v32 = vsel %vm3724_vm9, %v978_v11, %v985_v57  ;;  %v1279_v6 = vrot.slane %v1277_v9, 5  ;;  %v1281_v31 = vshrl.u32 %v4060_v29, 16  ;;  %v913_v9 = vld [vmem:[#allocation2 + $0x38] sm:$0xf] }
 0x13f   : > { %2293 = vrot.lane.b32.xlu0 %v2255_v27, %s3485_s29  ;;  %v1505_v27 = vshrl.u32 %v4062_v22, 16  ;;  %1090 = vst.msk [vmem:[#allocation3 + $0x18] sm:$0xf] %vm435_vm1, %v986_v32  ;;  %v994_v4 = vor.u32 %v992_v42, %v3970_v52  ;;  %v2063_v57 = vshll.u32 %v4002_v5, 16  ;;  %v2389_v1 = vrot.slane %v2387_v13, 4 }
 0x140   : > { %1960 = vrot.lane.b32.xlu1 %v1833_v50, %s3488_s14  ;;  %v1684_v50 = vld [vmem:[#allocation2 + $0x30] sm:$0xf]  ;;  %v1798_v11 = vrot.slane %v1797_v53, 4  ;;  %v1280_v54 = vsel %vm3665_vm5, %v1275_v55, %v1279_v6  ;;  %v4110_v52 = vld [vmem:[#allocation2 + $0x34] sm:$0xf]  ;;  %v2045_v29 = vshll.u32 %v3822_v47, 16 }
 0x141   : > { %v4094_v16 = vrot.slane %v1505_v27, 7  ;;  %v2349_v53 = vld [vmem:[#allocation2 + $0x24] sm:$0xf]  ;;  %v1804_v32 = vshrl.u32 %v4069_v33, 16  ;;  %v2058_v55 = vrot.slane %v3848_v56, 4  ;;  %v1025_v63 = vshrl.u32 %v4110_v52, 16 }
 0x142   : > { %v1034_v13 = vshrl.u32 %v913_v9, 16  ;;  %v2065_v47 = vor.u32 %v2063_v57, %v4038_v12  ;;  %v1283_v33 = vrot.slane %v1281_v31, 4 }
 0x143   : > { %1152 = vrot.lane.b32.xlu0 %v1110_v45, %s3482_s23  ;;  %v987_v45 = vrot.slane %v982_v62, 4  ;;  %v1512_v49 = vrot.slane %v4094_v16, 4  ;;  %v1519_v62 = vor.u32 %v1517_v14, %v4085_v43  ;;  %v4129_v14 = vrot.slane %v1025_v63, 7 }
 0x144   : > { %2190 = vrot.lane.b32.xlu1 %v2075_v38, %s3487_s13  ;;  %v4096_v38 = vrot.slane %v1800_v17, 5  ;;  %v1251_v17 = vshrl.u32 %v4049_v35, 16  ;;  %v2390_v35 = vor.u32 %v2389_v1, %v4072_v58  ;;  %v1834_v58 = vshrl.u32 %v3997_v23, 16  ;;  %v914_v23 = vld [vmem:[#allocation2 + $0x3c] sm:$0xf] }
 0x145   : > { %v995_v48 = vsel %vm3724_vm9, %v987_v45, %v994_v4  ;;  %v1520_v5 = vsel %vm3724_vm9, %v1512_v49, %v1519_v62  ;;  %v2393_v45 = vshll.u32 %v2349_v53, 16  ;;  %v1032_v12 = vrot.slane %v4129_v14, 4 }
 0x146   : > { %1091 = vst.msk [vmem:[#allocation3 + $0x1c] sm:$0xf] %vm435_vm1, %v995_v48  ;;  %v1803_v27 = vsel %vm3665_vm5, %v1798_v11, %v4096_v38  ;;  %v1036_v11 = vrot.slane %v1034_v13, 7  ;;  %v1253_v56 = vrot.slane %v1251_v17, 4  ;;  %v1806_v62 = vrot.slane %v1804_v32, 4 }
 0x147   : > { %1724 = vrot.lane.b32.xlu0 %v1684_v50, %s3484_s28  ;;  %v3250_v50 = vrot.slane %v2037_v0, 11  ;;  %v1037_v0 = vshll.u32 %v913_v9, 16  ;;  %v2066_v31 = vsel %vm3724_vm9, %v2058_v55, %v2065_v47  ;;  %v2391_v48 = vrot.slane %v2390_v35, 4  ;;  %v1111_v9 = vld [vmem:[#allocation2 + $0x34] sm:$0xf] }
 0x148   : > { %2529 = vrot.lane.b32.xlu1 %v2386_v26, %s3489_s16  ;;  %v2047_v26 = vor.u32 %v2045_v29, %v3843_v44  ;;  %v2256_v44 = vld [vmem:[#allocation2 + $0x34] sm:$0xf]  ;;  %v2395_v57 = vrot.slane %v2393_v45, 5  ;;  %v1508_v17 = vshll.u32 %v4062_v22, 16  ;;  %v1807_v32 = vor.u32 %v1806_v62, %v4096_v38  ;;  %v1778_v13 = vld [vmem:[#allocation2 + $0x24] sm:$0xf] }
 0x149   : > { %v1039_v4 = vor.u32 %v1037_v0, %v1036_v11  ;;  %v1836_v55 = vrot.slane %v1834_v58, 4  ;;  %v1043_v63 = vshrl.u32 %v914_v23, 16  ;;  %v1046_v45 = vshll.u32 %v914_v23, 16 }
 0x14a   : > { %v2048_v42 = vsel %vm3724_vm9, %v3250_v50, %v2047_v26  ;;  %v1254_v50 = vor.u32 %v1253_v56, %v4074_v24  ;;  %v1685_v26 = vld [vmem:[#allocation2 + $0x34] sm:$0xf]  ;;  %v1808_v0 = vrot.slane %v1807_v32, 4  ;;  %v1041_v56 = vrot.slane %v1036_v11, 4 }
 0x14b   : > { %1385 = vrot.lane.b32.xlu0 %v1250_v59, %s3483_s24  ;;  %v1204_v59 = vld [vmem:[#allocation2 + $0x24] sm:$0xf]  ;;  %v1040_v1 = vsel %vm3724_vm9, %v1032_v12, %v1039_v4  ;;  %v4149_v35 = vrot.slane %v1043_v63, 7  ;;  %v1844_v58 = vshrl.u32 %v1778_v13, 16  ;;  %v1485_v32 = vrot.slane %v3983_v46, 4 }
 0x14c   : > { %1391 = vrot.lane.b32.xlu1 %v1280_v54, %s3483_s24  ;;  %v1284_v54 = vor.u32 %v1283_v33, %v1279_v6  ;;  %v1287_v49 = vshll.u32 %v1204_v59, 16  ;;  %1096 = vst.msk [vmem:[#allocation3 + $0x30] sm:$0xf] %vm435_vm1, %v1040_v1  ;;  %v1291_v24 = vshrl.u32 %v1204_v59, 16  ;;  %v1503_v33 = vrot.slane %v3836_v51, 4 }
 0x14d   : > { %v1837_v59 = vor.u32 %v1836_v55, %v4036_v28  ;;  %v1048_v12 = vor.u32 %v1046_v45, %v4149_v35  ;;  %v911_v28 = vld [vmem:[#allocation2 + $0x30] sm:$0xf]  ;;  %v2417_v55 = vshrl.u32 %v3922_v34, 16  ;;  %v1014_v46 = vrot.slane %v4011_v60, 4 }
 0x14e   : > { %v1285_v6 = vrot.slane %v1284_v54, 4  ;;  %v1289_v29 = vrot.slane %v1287_v49, 5  ;;  %v1293_v49 = vrot.slane %v1291_v24, 4  ;;  %v4193_v63 = vld [vmem:[#allocation2 + $0x30] sm:$0xf]  ;;  %v1311_v45 = vshrl.u32 %v3956_v21, 16 }
 0x14f   : > { %1954 = vrot.lane.b32.xlu0 %v1803_v27, %s3488_s14  ;;  %v2397_v27 = vshrl.u32 %v2349_v53, 16  ;;  %v1255_v53 = vrot.slane %v1254_v50, 4  ;;  %v1049_v51 = vsel %vm3724_vm9, %v1041_v56, %v1048_v12  ;;  %v1864_v50 = vshrl.u32 %v3902_v2, 16  ;;  %v2026_v24 = vld [vmem:[#allocation2 + $0x30] sm:$0xf] }
 0x150   : > { %1621 = vrot.lane.b32.xlu1 %v1520_v5, %s3486_s30  ;;  %v2396_v5 = vsel %vm3665_vm5, %v2391_v48, %v2395_v57  ;;  %v1290_v38 = vsel %vm3665_vm5, %v1285_v6, %v1289_v29  ;;  %1097 = vst.msk [vmem:[#allocation3 + $0x34] sm:$0xf] %vm435_vm1, %v1049_v51  ;;  %v1813_v48 = vsel %vm3665_vm5, %v1808_v0, %v3850_v10  ;;  %v1019_v10 = vshll.u32 %v911_v28, 16  ;;  %v1455_v12 = vld [vmem:[#allocation2 + $0x30] sm:$0xf] }
 0x151   : > { %v2399_v47 = vrot.slane %v2397_v27, 4  ;;  %v1260_v4 = vsel %vm3665_vm5, %v1255_v53, %v3882_v41  ;;  %v1294_v1 = vor.u32 %v1293_v49, %v1289_v29  ;;  %v1016_v27 = vshrl.u32 %v911_v28, 16  ;;  %v1783_v51 = vld [vmem:[#allocation2 + $0x38] sm:$0xf] }
 0x152   : > { %v1870_v0 = vshll.u32 %v4193_v63, 16  ;;  %v1313_v49 = vrot.slane %v1311_v45, 4  ;;  %v4270_v45 = vld [vmem:[#allocation2 + $0x3c] sm:$0xf] }
 0x153   : > { %2184 = vrot.lane.b32.xlu0 %v2048_v42, %s3487_s13  ;;  %v1510_v42 = vor.u32 %v1508_v17, %v4094_v16  ;;  %v2400_v54 = vor.u32 %v2399_v47, %v2395_v57  ;;  %v1295_v2 = vrot.slane %v1294_v1, 4  ;;  %v1866_v47 = vrot.slane %v1864_v50, 4 }
 0x154   : > { %2295 = vrot.lane.b32.xlu1 %v2256_v44, %s3485_s29  ;;  %v1840_v44 = vshll.u32 %v1778_v13, 16  ;;  %v2099_v1 = vshll.u32 %v2026_v24, 16 }
 0x155   : > { %v1511_v62 = vsel %vm3724_vm9, %v1503_v33, %v1510_v42  ;;  %v2401_v57 = vrot.slane %v2400_v54, 4  ;;  %v1521_v33 = vrot.slane %v4085_v43, 4  ;;  %v1300_v21 = vsel %vm3665_vm5, %v1295_v2, %v3953_v61 }
 0x156   : > { %v1842_v41 = vrot.slane %v1840_v44, 5  ;;  %v2096_v43 = vshrl.u32 %v2026_v24, 16  ;;  %v1867_v56 = vor.u32 %v1866_v47, %v3936_v8  ;;  %v4237_v8 = vrot.slane %v1870_v0, 5 }
 0x157   : > { %2188 = vrot.lane.b32.xlu0 %v2066_v31, %s3487_s13  ;;  %v1838_v31 = vrot.slane %v1837_v59, 4  ;;  %v2406_v29 = vsel %vm3665_vm5, %v2401_v57, %v3926_v37  ;;  %v4202_v37 = vld [vmem:[%s4966_s4] sm:$0x3]  ;;  %v2419_v59 = vrot.slane %v2417_v55, 4  ;;  %v1529_v61 = vsel %vm3724_vm9, %v1521_v33, %v3965_v30 }
 0x158   : > { %1154 = vrot.lane.b32.xlu1 %v1111_v9, %s3482_s23  ;;  %v1846_v9 = vrot.slane %v1844_v58, 4  ;;  %3421 = vmatprep.subr.msk.bf16.mxu0 %vm545_vm0, %v4202_v37  ;;  %v2076_v58 = vrot.slane %v4028_v18, 4  ;;  %v1541_v18 = vshrl.u32 %v1455_v12, 16  ;;  %v1868_v57 = vrot.slane %v1867_v56, 4 }
 0x159   : > { %v1843_v17 = vsel %vm3665_vm5, %v1838_v31, %v1842_v41  ;;  %v4241_v31 = vld [vmem:[#allocation2 + $0x30] sm:$0xf]  ;;  %v2420_v30 = vor.u32 %v2419_v59, %v3973_v39  ;;  %v1314_v39 = vor.u32 %v1313_v49, %v3994_v3  ;;  %v2094_v24 = vrot.slane %v3894_v7, 4  ;;  %v4280_v59 = vld [vmem:[#allocation2 + $0x38] sm:$0xf] }
 0x15a   : > { %v4267_v3 = vrot.slane %v1541_v18, 7  ;;  %v1209_v49 = vld [vmem:[#allocation2 + $0x38] sm:$0xf] }
 0x15b   : > { %2531 = vrot.lane.b32.xlu0 %v2396_v5, %s3489_s16  ;;  %v4185_v5 = vrot.slane %v1016_v27, 7  ;;  %v1890_v27 = vshll.u32 %v1783_v51, 16  ;;  %v2421_v55 = vrot.slane %v2420_v30, 4  ;;  %v1028_v30 = vshll.u32 %v4110_v52, 16 }
 0x15c   : > { %1726 = vrot.lane.b32.xlu1 %v1685_v26, %s3484_s28  ;;  %v1847_v26 = vor.u32 %v1846_v9, %v1842_v41  ;;  %v4245_v41 = vld [vmem:[#allocation2 + $0x3c] sm:$0xf]  ;;  %v4247_v9 = vld [vmem:[#allocation2 + $0x38] sm:$0xf] }
 0x15d   : > { %v4151_v22 = vpop.permute.xlu0 %1712  ;;  %v1021_v53 = vor.u32 %v1019_v10, %v4185_v5  ;;  %v2354_v10 = vld [vmem:[#allocation2 + $0x38] sm:$0xf] }
 0x15e   : > { %v1848_v42 = vrot.slane %v1847_v26, 4  ;;  %v1568_v26 = vshrl.u32 %v4245_v41, 16  ;;  %v2443_v33 = vshll.u32 %v2354_v10, 16 }
 0x15f   : > { %1393 = vrot.lane.b32.xlu0 %v1290_v38, %s3483_s24  ;;  %v1493_v38 = vsel %vm3724_vm9, %v1485_v32, %v3960_v25  ;;  %v1022_v60 = vsel %vm3724_vm9, %v1014_v46, %v1021_v53  ;;  %v4219_v25 = vld [vmem:[#allocation2 + $0x30] sm:$0xf]  ;;  %v1317_v32 = vshll.u32 %v4241_v31, 16  ;;  %v1559_v46 = vshrl.u32 %v4247_v9, 16  ;;  %v2029_v53 = vld [vmem:[#allocation2 + $0x3c] sm:$0xf] }
 0x160   : > { %1387 = vrot.lane.b32.xlu1 %v1260_v4, %s3483_s24  ;;  %1094 = vst.msk [vmem:[#allocation3 + $0x28] sm:$0xf] %vm435_vm1, %v1022_v60  ;;  %v2423_v54 = vshll.u32 %v4219_v25, 16  ;;  %v1853_v28 = vsel %vm3665_vm5, %v1848_v42, %v3904_v15  ;;  %v1894_v15 = vshrl.u32 %v1783_v51, 16  ;;  %v2447_v60 = vshrl.u32 %v2354_v10, 16 }
 0x161   : > { %v4166_v16 = vpop.permute.xlu0 %2281  ;;  %v1315_v42 = vrot.slane %v1314_v39, 4  ;;  %v4278_v0 = vrot.slane %v1317_v32, 5  ;;  %v1341_v39 = vshrl.u32 %v1209_v49, 16  ;;  %v1023_v32 = vrot.slane %v4185_v5, 4 }
 0x162   : > { %v4169_v11 = vpop.permute.xlu1 %1714  ;;  %v1030_v10 = vor.u32 %v1028_v30, %v4129_v14  ;;  %v2027_v14 = vld [vmem:[#allocation2 + $0x34] sm:$0xf] }
 0x163   : > { %1619 = vrot.lane.b32.xlu0 %v1511_v62, %s3486_s30  ;;  %v4239_v62 = vrot.slane %v2096_v43, 7  ;;  %v1544_v43 = vshll.u32 %v1455_v12, 16  ;;  %v4291_v12 = vrot.slane %v1559_v46, 7  ;;  %v1320_v52 = vsel %vm3665_vm5, %v1315_v42, %v4278_v0 }
 0x164   : > { %1956 = vrot.lane.b32.xlu1 %v1813_v48, %s3488_s14  ;;  %v1343_v42 = vrot.slane %v1341_v39, 4 }
 0x165   : > { %v1141_v23 = vpop.permute.xlu0 %1140  ;;  %v2101_v2 = vor.u32 %v2099_v1, %v4239_v62  ;;  %v1546_v51 = vor.u32 %v1544_v43, %v4267_v3  ;;  %v4299_v1 = vrot.slane %v2443_v33, 5  ;;  %v1566_v5 = vrot.slane %v4291_v12, 4 }
 0x166   : > { %1185 = vst.msk [vmem:[#allocation3 + $0x10] sm:$0xf] %vm1180_vm8, %v1141_v23  ;;  %v4180_v6 = vpop.permute.xlu1 %2283  ;;  %v2084_v23 = vsel %vm3724_vm9, %v2076_v58, %v3989_v19  ;;  %v1690_v19 = vld [vmem:[#allocation2 + $0x48] sm:$0xf]  ;;  %v1571_v58 = vshll.u32 %v4245_v41, 16  ;;  %v2449_v41 = vrot.slane %v2447_v60, 4 }
 0x167   : > { %1962 = vrot.lane.b32.xlu0 %v1843_v17, %s3488_s14  ;;  %v4255_v17 = vrot.slane %v2423_v54, 5  ;;  %v2102_v56 = vsel %vm3724_vm9, %v2094_v24, %v2101_v2  ;;  %v2123_v54 = vshrl.u32 %v2029_v53, 16 }
 0x168   : > { %2533 = vrot.lane.b32.xlu1 %v2406_v29, %s3489_s16  ;;  %v1873_v29 = vsel %vm3665_vm5, %v1868_v57, %v4237_v8  ;;  %v2114_v57 = vshrl.u32 %v4280_v59, 16 }
 0x169   : > { %v4197_v13 = vpop.permute.xlu0 %1720  ;;  %v2426_v7 = vsel %vm3665_vm5, %v2421_v55, %v4255_v17  ;;  %v4311_v2 = vrot.slane %v2123_v54, 7  ;;  %v1031_v55 = vsel %vm3724_vm9, %v1023_v32, %v1030_v10  ;;  %v3452_v54 = vld [vmem:[%s4965_s3 + $0x20] ss:$0 sps:$4 sm:$0xff]  }
 0x16a   : > { %v1143_v34 = vpop.permute.xlu1 %1142  ;;  %1095 = vst.msk [vmem:[#allocation3 + $0x2c] sm:$0xf] %vm435_vm1, %v1031_v55  ;;  %3420 = vmatprep.subr.msk.bf16.mxu1 %vm2709_vm11, %v3452_v54  ;;  %v3454_v55 = vld [vmem:[%s4965_s3 + $0x10] sm:$0xff]  }
 0x16b   : > { %1186 = vst.msk [vmem:[#allocation3 + $0x14] sm:$0xf] %vm1180_vm8, %v1143_v34  ;;  %1615 = vrot.lane.b32.xlu0 %v1493_v38, %s3486_s30  ;;  %v4272_v34 = vrot.slane %v1890_v27, 5  ;;  %v1896_v38 = vrot.slane %v1894_v15, 4  ;;  %v4301_v15 = vld [vmem:[#allocation2 + $0x3c] sm:$0xf] }
 0x16c   : > { %1395 = vrot.lane.b32.xlu1 %v1300_v21, %s3483_s24  ;;  %v2453_v33 = vshll.u32 %v4301_v15, 16 }
 0x16d   : > { %v4223_v44 = vpop.permute.xlu0 %2289 }
 0x16e   : > { %v4226_v4 = vpop.permute.xlu1 %1722 }
 0x16f   : > { %1623 = vrot.lane.b32.xlu0 %v1529_v61, %s3486_s30  ;;  %v4286_v61 = vrot.slane %v1568_v26, 7  ;;  %v1539_v26 = vrot.slane %v3876_v36, 4 }
 0x170   : > { %1964 = vrot.lane.b32.xlu1 %v1853_v28, %s3488_s14  ;;  %v1900_v28 = vshll.u32 %v4270_v45, 16 }
 0x171   : > { %v1149_v48 = vpop.permute.xlu0 %1148  ;;  %v1547_v36 = vsel %vm3724_vm9, %v1539_v26, %v1546_v51 }
 0x172   : > { %1189 = vst.msk [vmem:[#allocation3 + $0x20] sm:$0xf] %vm1180_vm8, %v1149_v48  ;;  %v4250_v50 = vpop.permute.xlu1 %2291  ;;  %v1897_v48 = vor.u32 %v1896_v38, %v4272_v34  ;;  %v2126_v38 = vshll.u32 %v2029_v53, 16 }
 0x173   : > { %2192 = vrot.lane.b32.xlu0 %v2084_v23, %s3487_s13  ;;  %v1337_v23 = vshll.u32 %v1209_v49, 16  ;;  %v1456_v49 = vld [vmem:[#allocation2 + $0x34] sm:$0xf] }
 0x174   : > { %1968 = vrot.lane.b32.xlu1 %v1873_v29, %s3488_s14  ;;  %v1573_v29 = vor.u32 %v1571_v58, %v4286_v61  ;;  %v1898_v46 = vrot.slane %v1897_v48, 4  ;;  %v2128_v53 = vor.u32 %v2126_v38, %v4311_v2  ;;  %v2105_v58 = vshrl.u32 %v2027_v14, 16 }
 0x175   : > { %v1137_v47 = vpop.permute.xlu0 %1136  ;;  %v4347_v48 = vrot.slane %v2453_v33, 5 }
 0x176   : > { %1183 = vst.msk [vmem:[#allocation3 + $0x8] sm:$0xf] %vm1180_vm8, %v1137_v47  ;;  %v1151_v21 = vpop.permute.xlu1 %1150  ;;  %v4322_v47 = vrot.slane %v2114_v57, 7  ;;  %v1574_v43 = vsel %vm3724_vm9, %v1566_v5, %v1573_v29  ;;  %v3453_v57 = vld [vmem:[%s4965_s3 + $0x18] sm:$0xff]   ;;  %v4360_v10 = vrot.slane %v2105_v58, 7  ;;  %v2711_v29 = vsel %vm2709_vm11, %v3452_v54, 0 }
 0x177   : > { %1190 = vst.msk [vmem:[#allocation3 + $0x24] sm:$0xf] %vm1180_vm8, %v1151_v21  ;;  %1736 = vrot.lane.b32.xlu0 %v1690_v19, %s3484_s28  ;;  %v4316_v19 = vrot.slane %v1900_v28, 5  ;;  %v2450_v21 = vor.u32 %v2449_v41, %v4299_v1  ;;  %3369 = vmatpush3.bf16.msra.mxu1 %v2711_v29  ;;  %v2108_v5 = vshll.u32 %v2027_v14, 16  ;;  %v2939_v58 = vsel %vm545_vm0, %v4202_v37, 0 }
 0x178   : > { %2537 = vrot.lane.b32.xlu1 %v2426_v7, %s3489_s16  ;;  %v4331_v7 = vrot.slane %v1337_v23, 5  ;;  %v2121_v30 = vrot.slane %v4322_v47, 4  ;;  %3370 = vmatprep.subr.bf16.mxu1 %v3453_v57  ;;  %v916_v54 = vld [vmem:[#allocation2 + $0x44] sm:$0xf]  ;;  %vm2232_vm0 = vcmask 454016  }
 0x179   : > { %v4295_v18 = vpop.permute.xlu0 %1708  ;;  %v1903_v28 = vsel %vm3665_vm5, %v1898_v46, %v4316_v19  ;;  %v2110_v14 = vor.u32 %v2108_v5, %v4360_v10  ;;  %3395 = vmatpush3.bf16.msra.mxu0 %v2939_v58  ;;  %v1321_v58 = vshrl.u32 %v4241_v31, 16 }
 0x17a   : > { %v1139_v27 = vpop.permute.xlu1 %1138  ;;  %v1344_v23 = vor.u32 %v1343_v42, %v4331_v7  ;;  %v2129_v32 = vsel %vm3724_vm9, %v2121_v30, %v2128_v53  ;;  %v1691_v42 = vld [vmem:[#allocation2 + $0x4c] sm:$0xf]  ;;  %v915_v53 = vld [vmem:[#allocation2 + $0x40] sm:$0xf]  ;;  %v2103_v30 = vrot.slane %v4239_v62, 4 }
 0x17b   : > { %1184 = vst.msk [vmem:[#allocation3 + $0xc] sm:$0xf] %vm1180_vm8, %v1139_v27  ;;  %2196 = vrot.lane.b32.xlu0 %v2102_v56, %s3487_s13  ;;  %v4337_v56 = vld [vmem:[#allocation2 + $0x3c] sm:$0xf]  ;;  %v2451_v27 = vrot.slane %v2450_v21, 4  ;;  %v3458_v21 = vld [vmem:[%s3632_s19] sm:$0xff]   ;;  %3371 = vmatpush3.bf16.msra.mxu1 %v3453_v57 }
 0x17c   : > { %1399 = vrot.lane.b32.xlu1 %v1320_v52, %s3483_s24  ;;  %v1347_v39 = vshll.u32 %v4337_v56, 16  ;;  %v1550_v52 = vshrl.u32 %v1456_v49, 16  ;;  %v1345_v33 = vrot.slane %v1344_v23, 4  ;;  %3372 = vmatprep.subr.bf16.mxu1 %v3454_v55  ;;  %v3456_v23 = vld [vmem:[%s4965_s3 + $0x8] sm:$0xff]   ;;  %v2111_v62 = vsel %vm3724_vm9, %v2103_v30, %v2110_v14 }
 0x17d   : > { %v4320_v24 = vpop.permute.xlu0 %2285  ;;  %v2456_v38 = vsel %vm3665_vm5, %v2451_v27, %v4347_v48  ;;  %v1553_v27 = vshll.u32 %v1456_v49, 16  ;;  %3396 = vmatprep.mubr.msk.bf16.mxu0 %vm2913_vm12, %v3458_v21  ;;  %v1055_v5 = vshll.u32 %v915_v53, 16  ;;  %v3457_v21 = vld [vmem:[%s4965_s3] sm:$0xff]   ;;  %v1064_v14 = vshll.u32 %v916_v54, 16 }
 0x17e   : > { %v4326_v60 = vpop.permute.xlu1 %1710 }
 0x17f   : > { %1627 = vrot.lane.b32.xlu0 %v1547_v36, %s3486_s30  ;;  %v4371_v36 = vrot.slane %v1347_v39, 5  ;;  %v3459_v39 = vld [vmem:[%s3632_s19 + $0x8] sm:$0xff]   ;;  %3373 = vmatpush3.bf16.msra.mxu1 %v3454_v55  ;;  %v2259_v55 = vld [vmem:[#allocation2 + $0x40] sm:$0xf] }
 0x180   : > { %1633 = vrot.lane.b32.xlu1 %v1574_v43, %s3486_s30  ;;  %v4377_v43 = vrot.slane %v1550_v52, 7  ;;  %v1061_v52 = vshrl.u32 %v916_v54, 16  ;;  %3374 = vmatprep.subr.bf16.mxu1 %v3456_v23  ;;  %v1208_v54 = vld [vmem:[#allocation2 + $0x34] sm:$0xf] }
 0x181   : > { %v1145_v51 = vpop.permute.xlu0 %1144  ;;  %v1350_v37 = vsel %vm3665_vm5, %v1345_v33, %v4371_v36  ;;  %v1548_v33 = vrot.slane %v4267_v3, 4  ;;  %3397 = vmatmul.mubr.msk.bf16.vlgmr.msra.gmra.mxu0 %vm2913_vm12, %v3459_v39 }
 0x182   : > { %1187 = vst.msk [vmem:[#allocation3 + $0x18] sm:$0xf] %vm1180_vm8, %v1145_v51  ;;  %v4353_v41 = vpop.permute.xlu1 %2287  ;;  %v2427_v51 = vshrl.u32 %v4219_v25, 16  ;;  %v1052_v25 = vshrl.u32 %v915_v53, 16  ;;  %v1555_v49 = vor.u32 %v1553_v27, %v4377_v43  ;;  %v1050_v53 = vrot.slane %v4149_v35, 4 }
 0x183   : > { %1974 = vrot.lane.b32.xlu0 %v1903_v28, %s3488_s14  ;;  %3375 = vmatpush3.bf16.msra.mxu1 %v3456_v23  ;;  %v1114_v35 = vld [vmem:[#allocation2 + $0x40] sm:$0xf]  ;;  %v2260_v23 = vld [vmem:[#allocation2 + $0x44] sm:$0xf] }
 0x184   : > { %2202 = vrot.lane.b32.xlu1 %v2129_v32, %s3487_s13  ;;  %v2353_v32 = vld [vmem:[#allocation2 + $0x34] sm:$0xf]  ;;  %v1054_v29 = vrot.slane %v1052_v25, 7  ;;  %v1556_v3 = vsel %vm3724_vm9, %v1548_v33, %v1555_v49  ;;  %3376 = vmatprep.subr.bf16.mxu1 %v3457_v21  ;;  %v1874_v49 = vshrl.u32 %v4193_v63, 16 }
 0x185   : > { %v4363_v26 = vpop.permute.xlu0 %1716  ;;  %v2433_v27 = vshll.u32 %v2353_v32, 16 }
 0x186   : > { %v1147_v46 = vpop.permute.xlu1 %1146  ;;  %v1059_v25 = vrot.slane %v1054_v29, 4 }
 0x187   : > { %1188 = vst.msk [vmem:[#allocation3 + $0x1c] sm:$0xf] %vm1180_vm8, %v1147_v46  ;;  %2543 = vrot.lane.b32.xlu0 %v2456_v38, %s3489_s16  ;;  %v2429_v46 = vrot.slane %v2427_v51, 4  ;;  %v1057_v51 = vor.u32 %v1055_v5, %v1054_v29  ;;  %v1323_v29 = vrot.slane %v1321_v58, 4  ;;  %v2435_v33 = vrot.slane %v2433_v27, 5  ;;  %3377 = vmatpush3.bf16.msra.mxu1 %v3457_v21 }
 0x188   : > { %1738 = vrot.lane.b32.xlu1 %v1691_v42, %s3484_s28  ;;  %v1063_v42 = vrot.slane %v1061_v52, 7  ;;  %v1115_v27 = vld [vmem:[#allocation2 + $0x44] sm:$0xf] }
 0x189   : > { %v4383_v28 = vpop.permute.xlu0 %1728  ;;  %v1058_v31 = vsel %vm3724_vm9, %v1050_v53, %v1057_v51  ;;  %v1688_v53 = vld [vmem:[#allocation2 + $0x40] sm:$0xf] }
 0x18a   : > { %v4390_v57 = vpop.permute.xlu1 %1718  ;;  %v1066_v39 = vor.u32 %v1064_v14, %v1063_v42  ;;  %1098 = vst.msk [vmem:[#allocation3 + $0x38] sm:$0xf] %vm435_vm1, %v1058_v31  ;;  %v1327_v42 = vshll.u32 %v1208_v54, 16  ;;  %v1331_v14 = vshrl.u32 %v1208_v54, 16 }
 0x18b   : > { %1405 = vrot.lane.b32.xlu0 %v1350_v37, %s3483_s24  ;;  %v2437_v37 = vshrl.u32 %v2353_v32, 16  ;;  %v2430_v32 = vor.u32 %v2429_v46, %v4255_v17  ;;  %v1876_v17 = vrot.slane %v1874_v49, 4  ;;  %v1324_v46 = vor.u32 %v1323_v29, %v4278_v0 }
 0x18c   : > { %2198 = vrot.lane.b32.xlu1 %v2111_v62, %s3487_s13  ;;  %v1067_v52 = vsel %vm3724_vm9, %v1059_v25, %v1066_v39  ;;  %v1333_v54 = vrot.slane %v1331_v14, 4  ;;  %v3464_v14 = vld [vmem:[%s3632_s19 + $0x18] sm:$0xff]  }
 0x18d   : > { %v4401_v38 = vpop.permute.xlu0 %2297  ;;  %1099 = vst.msk [vmem:[#allocation3 + $0x3c] sm:$0xf] %vm435_vm1, %v1067_v52  ;;  %v2431_v51 = vrot.slane %v2430_v32, 4  ;;  %v1877_v21 = vor.u32 %v1876_v17, %v4237_v8  ;;  %v1689_v52 = vld [vmem:[#allocation2 + $0x44] sm:$0xf]  ;;  %v3462_v8 = vld [vmem:[%s3632_s19 + $0x10] sm:$0xff]  }
 0x18e   : > { %v1384_v30 = vpop.permute.xlu1 %1383  ;;  %3400 = vmatprep.mubr.msk.bf16.mxu0 %vm2913_vm12, %v3462_v8  ;;  %vm2329_vm1 = vcmask 519616  }
 0x18f   : > { %1431 = vst.msk [vmem:[#allocation3 + $0x4] sm:$0xf] %vm1429_vm10, %v1384_v30  ;;  %2301 = vrot.lane.b32.xlu0 %v2259_v55, %s3485_s29  ;;  %v2439_v30 = vrot.slane %v2437_v37, 4  ;;  %v1782_v55 = vld [vmem:[#allocation2 + $0x34] sm:$0xf]  ;;  %v1329_v37 = vrot.slane %v1327_v42, 5  ;;  %3401 = vmatmul.mubr.msk.bf16.gmra.mxu0 %vm2913_vm12, %v3464_v14 }
 0x190   : > { %1629 = vrot.lane.b32.xlu1 %v1556_v3, %s3486_s30  ;;  %v1880_v3 = vshll.u32 %v1782_v55, 16  ;;  %v1884_v39 = vshrl.u32 %v1782_v55, 16  ;;  %v1878_v55 = vrot.slane %v1877_v21, 4 }
 0x191   : > { %v1157_v62 = vpop.permute.xlu0 %1156  ;;  %v2440_v25 = vor.u32 %v2439_v30, %v2435_v33 }
 0x192   : > { %1193 = vst.msk [vmem:[#allocation3 + $0x30] sm:$0xf] %vm1180_vm8, %v1157_v62  ;;  %v4423_v5 = vpop.permute.xlu1 %1617  ;;  %v2436_v62 = vsel %vm3665_vm5, %v2431_v51, %v2435_v33  ;;  %v1882_v32 = vrot.slane %v1880_v3, 5  ;;  %v1886_v29 = vrot.slane %v1884_v39, 4  ;;  %v1562_v51 = vshll.u32 %v4247_v9, 16 }
 0x193   : > { %1160 = vrot.lane.b32.xlu0 %v1114_v35, %s3482_s23  ;;  %v1325_v35 = vrot.slane %v1324_v46, 4  ;;  %v2441_v49 = vrot.slane %v2440_v25, 4  ;;  %v2030_v46 = vld [vmem:[#allocation2 + $0x40] sm:$0xf]  ;;  %v1557_v25 = vrot.slane %v4377_v43, 4  ;;  %v2117_v43 = vshll.u32 %v4280_v59, 16 }
 0x194   : > { %2303 = vrot.lane.b32.xlu1 %v2260_v23, %s3485_s29  ;;  %v1904_v23 = vshrl.u32 %v4270_v45, 16  ;;  %v1887_v45 = vor.u32 %v1886_v29, %v1882_v32  ;;  %v4461_v3 = vld [vmem:[#allocation2 + $0x40] sm:$0xf]  ;;  %v1883_v39 = vsel %vm3665_vm5, %v1878_v55, %v1882_v32  ;;  %v2132_v21 = vshrl.u32 %v2030_v46, 16 }
 0x195   : > { %v1612_v63 = vpop.permute.xlu0 %1611  ;;  %v1330_v33 = vsel %vm3665_vm5, %v1325_v35, %v1329_v37  ;;  %v2356_v9 = vld [vmem:[#allocation2 + $0x40] sm:$0xf]  ;;  %v1910_v35 = vshll.u32 %v4461_v3, 16  ;;  %v1351_v32 = vshrl.u32 %v4337_v56, 16 }
 0x196   : > { %1660 = vst.msk [vmem:[#allocation3] sm:$0xf] %vm1659_vm13, %v1612_v63  ;;  %v4430_v58 = vpop.permute.xlu1 %2186  ;;  %v2446_v63 = vsel %vm3665_vm5, %v2441_v49, %v4299_v1  ;;  %v4489_v8 = vrot.slane %v2132_v21, 7  ;;  %v2463_v14 = vshll.u32 %v2356_v9, 16  ;;  %v1211_v55 = vld [vmem:[#allocation2 + $0x40] sm:$0xf] }
 0x197   : > { %1732 = vrot.lane.b32.xlu0 %v1688_v53, %s3484_s28  ;;  %1757 = vst.msk [vmem:[#allocation3] sm:$0xf] %vm1756_vm14, %v4295_v18  ;;  %v1334_v18 = vor.u32 %v1333_v54, %v1329_v37  ;;  %v1906_v53 = vrot.slane %v1904_v23, 4  ;;  %v1564_v54 = vor.u32 %v1562_v51, %v4291_v12  ;;  %v2112_v12 = vrot.slane %v4360_v10, 4 }
 0x198   : > { %1162 = vrot.lane.b32.xlu1 %v1115_v27, %s3482_s23  ;;  %v2457_v27 = vshrl.u32 %v4301_v15, 16  ;;  %v4495_v10 = vrot.slane %v1910_v35, 5  ;;  %v2465_v21 = vrot.slane %v2463_v14, 5 }
 0x199   : > { %v4436_v0 = vpop.permute.xlu0 %1958  ;;  %v1335_v17 = vrot.slane %v1334_v18, 4  ;;  %v1907_v49 = vor.u32 %v1906_v53, %v4316_v19  ;;  %v1565_v29 = vsel %vm3724_vm9, %v1557_v25, %v1564_v54  ;;  %v2467_v19 = vshrl.u32 %v2356_v9, 16 }
 0x19a   : > { %v4439_v31 = vpop.permute.xlu1 %1625  ;;  %v2459_v23 = vrot.slane %v2457_v27, 4  ;;  %v1353_v27 = vrot.slane %v1351_v32, 4  ;;  %v1361_v25 = vshrl.u32 %v1211_v55, 16 }
 0x19b   : > { %2539 = vrot.lane.b32.xlu0 %v2436_v62, %s3489_s16  ;;  %v1340_v15 = vsel %vm3665_vm5, %v1335_v17, %v4331_v7  ;;  %v1888_v62 = vrot.slane %v1887_v45, 4  ;;  %v2119_v7 = vor.u32 %v2117_v43, %v4322_v47  ;;  %v2135_v17 = vshll.u32 %v2030_v46, 16  ;;  %v1462_v45 = vld [vmem:[#allocation2 + $0x4c] sm:$0xf]  ;;  %v4513_v46 = vld [vmem:[#allocation2 + $0x44] sm:$0xf] }
 0x19c   : > { %1734 = vrot.lane.b32.xlu1 %v1689_v52, %s3484_s28  ;;  %v1459_v52 = vld [vmem:[#allocation2 + $0x40] sm:$0xf]  ;;  %v2460_v51 = vor.u32 %v2459_v23, %v4347_v48  ;;  %v2130_v43 = vrot.slane %v4311_v2, 4  ;;  %v1363_v14 = vrot.slane %v1361_v25, 4  ;;  %v2473_v2 = vshll.u32 %v4513_v46, 16 }
 0x19d   : > { %v4446_v42 = vpop.permute.xlu0 %2527  ;;  %v1893_v56 = vsel %vm3665_vm5, %v1888_v62, %v4272_v34  ;;  %v2120_v47 = vsel %vm3724_vm9, %v2112_v12, %v2119_v7  ;;  %v2137_v54 = vor.u32 %v2135_v17, %v4489_v8  ;;  %v1604_v62 = vshrl.u32 %v1462_v45, 16  ;;  %v2031_v12 = vld [vmem:[#allocation2 + $0x44] sm:$0xf] }
 0x19e   : > { %v4450_v30 = vpop.permute.xlu1 %2194  ;;  %v1580_v35 = vshll.u32 %v1459_v52, 16  ;;  %v1354_v7 = vor.u32 %v1353_v27, %v4371_v36  ;;  %v1460_v17 = vld [vmem:[#allocation2 + $0x44] sm:$0xf]  ;;  %v1575_v27 = vrot.slane %v4286_v61, 4 }
 0x19f   : > { %1401 = vrot.lane.b32.xlu0 %v1330_v33, %s3483_s24  ;;  %v1577_v33 = vshrl.u32 %v1459_v52, 16  ;;  %v4524_v52 = vld [vmem:[#allocation2 + $0x44] sm:$0xf]  ;;  %v1586_v61 = vshrl.u32 %v1460_v17, 16 }
 0x1a0   : > { %2541 = vrot.lane.b32.xlu1 %v2446_v63, %s3489_s16  ;;  %v1908_v63 = vrot.slane %v1907_v49, 4 }
 0x1a1   : > { %v1390_v37 = vpop.permute.xlu0 %1389  ;;  %v4506_v9 = vrot.slane %v1577_v33, 7  ;;  %v2138_v33 = vsel %vm3724_vm9, %v2130_v43, %v2137_v54  ;;  %v1607_v54 = vshll.u32 %v1462_v45, 16  ;;  %v4542_v43 = vrot.slane %v2473_v2, 5  ;;  %v1786_v2 = vld [vmem:[#allocation2 + $0x44] sm:$0xf] }
 0x1a2   : > { %1434 = vst.msk [vmem:[#allocation3 + $0x10] sm:$0xf] %vm1429_vm10, %v1390_v37  ;;  %v4467_v1 = vpop.permute.xlu1 %1730  ;;  %v1357_v37 = vshll.u32 %v1211_v55, 16  ;;  %v1913_v48 = vsel %vm3665_vm5, %v1908_v63, %v4495_v10  ;;  %v2141_v63 = vshrl.u32 %v2031_v12, 16 }
 0x1a3   : > { %1970 = vrot.lane.b32.xlu0 %v1883_v39, %s3488_s14  ;;  %v4503_v39 = vld [vmem:[#allocation2 + $0x48] sm:$0xf]  ;;  %v1582_v55 = vor.u32 %v1580_v35, %v4506_v9  ;;  %v2477_v35 = vshrl.u32 %v4513_v46, 16 }
 0x1a4   : > { %1403 = vrot.lane.b32.xlu1 %v1340_v15, %s3483_s24  ;;  %v2469_v15 = vrot.slane %v2467_v19, 4  ;;  %v1595_v49 = vshrl.u32 %v4503_v39, 16  ;;  %v1359_v23 = vrot.slane %v1357_v37, 5 }
 0x1a5   : > { %v4482_v18 = vpop.permute.xlu0 %1966 }
 0x1a6   : > { %v4487_v59 = vpop.permute.xlu1 %2299  ;;  %v1597_v37 = vrot.slane %v1595_v49, 7  ;;  %v4548_v49 = vrot.slane %v2141_v63, 7 }
 0x1a7   : > { %1631 = vrot.lane.b32.xlu0 %v1565_v29, %s3486_s30  ;;  %v2461_v29 = vrot.slane %v2460_v51, 4  ;;  %v1914_v51 = vshrl.u32 %v4461_v3, 16  ;;  %v1583_v3 = vsel %vm3724_vm9, %v1575_v27, %v1582_v55  ;;  %v2479_v27 = vrot.slane %v2477_v35, 4 }
 0x1a8   : > { %1972 = vrot.lane.b32.xlu1 %v1893_v56, %s3488_s14  ;;  %v2470_v56 = vor.u32 %v2469_v15, %v2465_v21  ;;  %v1364_v15 = vor.u32 %v1363_v14, %v1359_v23 }
 0x1a9   : > { %v4500_v53 = vpop.permute.xlu0 %2535  ;;  %v2466_v36 = vsel %vm3665_vm5, %v2461_v29, %v2465_v21  ;;  %v1367_v21 = vshll.u32 %v4524_v52, 16  ;;  %v1602_v29 = vrot.slane %v1597_v37, 4  ;;  %v1916_v55 = vrot.slane %v1914_v51, 4 }
 0x1aa   : > { %v1159_v34 = vpop.permute.xlu1 %1158  ;;  %v1365_v14 = vrot.slane %v1364_v15, 4 }
 0x1ab   : > { %1194 = vst.msk [vmem:[#allocation3 + $0x34] sm:$0xf] %vm1180_vm8, %v1159_v34  ;;  %2200 = vrot.lane.b32.xlu0 %v2120_v47, %s3487_s13  ;;  %v1606_v47 = vrot.slane %v1604_v62, 7  ;;  %v1355_v34 = vrot.slane %v1354_v7, 4  ;;  %v2471_v62 = vrot.slane %v2470_v56, 4 }
 0x1ac   : > { %1976 = vrot.lane.b32.xlu1 %v1913_v48, %s3488_s14 }
 0x1ad   : > { %v1398_v32 = vpop.permute.xlu0 %1397  ;;  %v1609_v45 = vor.u32 %v1607_v54, %v1606_v47  ;;  %v2476_v46 = vsel %vm3665_vm5, %v2471_v62, %v4542_v43  ;;  %v1589_v54 = vshll.u32 %v1460_v17, 16  ;;  %v1917_v62 = vor.u32 %v1916_v55, %v4495_v10 }
 0x1ae   : > { %1438 = vst.msk [vmem:[#allocation3 + $0x20] sm:$0xf] %vm1429_vm10, %v1398_v32  ;;  %v1614_v19 = vpop.permute.xlu1 %1613  ;;  %v1787_v32 = vld [vmem:[#allocation2 + $0x48] sm:$0xf] }
 0x1af   : > { %1661 = vst.msk [vmem:[#allocation3 + $0x4] sm:$0xf] %vm1659_vm13, %v1614_v19  ;;  %2204 = vrot.lane.b32.xlu0 %v2138_v33, %s3487_s13  ;;  %v4551_v19 = vrot.slane %v1367_v21, 5  ;;  %v2144_v33 = vshll.u32 %v2031_v12, 16  ;;  %v1934_v47 = vshrl.u32 %v1787_v32, 16  ;;  %v1610_v63 = vsel %vm3724_vm9, %v1602_v29, %v1609_v45 }
 0x1b0   : > { %2545 = vrot.lane.b32.xlu1 %v2466_v36, %s3489_s16  ;;  %1758 = vst.msk [vmem:[#allocation3 + $0x4] sm:$0xf] %vm1756_vm14, %v4326_v60  ;;  %v1360_v60 = vsel %vm3665_vm5, %v1355_v34, %v1359_v23  ;;  %v1588_v23 = vrot.slane %v1586_v61, 7  ;;  %v1930_v36 = vshll.u32 %v1787_v32, 16  ;;  %v1371_v12 = vshrl.u32 %v4524_v52, 16 }
 0x1b1   : > { %v4535_v25 = vpop.permute.xlu0 %2293  ;;  %v2146_v51 = vor.u32 %v2144_v33, %v4548_v49  ;;  %v2139_v34 = vrot.slane %v4489_v8, 4  ;;  %v1370_v21 = vsel %vm3665_vm5, %v1365_v14, %v4551_v19  ;;  %v1920_v61 = vshll.u32 %v1786_v2, 16  ;;  %v4575_v45 = vld [vmem:[#allocation2 + $0x48] sm:$0xf] }
 0x1b2   : > { %v4538_v48 = vpop.permute.xlu1 %1960  ;;  %v1591_v35 = vor.u32 %v1589_v54, %v1588_v23  ;;  %v4577_v32 = vrot.slane %v1930_v36, 5  ;;  %v1936_v8 = vrot.slane %v1934_v47, 4  ;;  %v1924_v29 = vshrl.u32 %v1786_v2, 16  ;;  %v4586_v47 = vld [vmem:[#allocation2 + $0x48] sm:$0xf] }
 0x1b3   : > { %1635 = vrot.lane.b32.xlu0 %v1583_v3, %s3486_s30  ;;  %v1598_v3 = vshll.u32 %v4503_v39, 16  ;;  %v2147_v17 = vsel %vm3724_vm9, %v2139_v34, %v2146_v51  ;;  %v2480_v39 = vor.u32 %v2479_v27, %v4542_v43  ;;  %v1373_v10 = vrot.slane %v1371_v12, 4  ;;  %v1213_v12 = vld [vmem:[#allocation2 + $0x48] sm:$0x1]  ;;  %v4594_v51 = vld [vmem:[#allocation2 + $0x4c] sm:$0xf] }
 0x1b4   : > { %1407 = vrot.lane.b32.xlu1 %v1360_v60, %s3483_s24  ;;  %v1593_v60 = vrot.slane %v1588_v23, 4  ;;  %v1584_v33 = vrot.slane %v4506_v9, 4  ;;  %v1922_v23 = vrot.slane %v1920_v61, 5  ;;  %v2483_v36 = vshll.u32 %v4575_v45, 16 }
 0x1b5   : > { %v1153_v7 = vpop.permute.xlu0 %1152  ;;  %v1600_v14 = vor.u32 %v1598_v3, %v1597_v37  ;;  %v1937_v9 = vor.u32 %v1936_v8, %v4577_v32  ;;  %v2481_v27 = vrot.slane %v2480_v39, 4  ;;  %v1374_v54 = vor.u32 %v1373_v10, %v4551_v19  ;;  %v2034_v3 = vld [vmem:[#allocation2 + $0x50] sm:$0xf] }
 0x1b6   : > { %1191 = vst.msk [vmem:[#allocation3 + $0x28] sm:$0xf] %vm1180_vm8, %v1153_v7  ;;  %v4554_v56 = vpop.permute.xlu1 %2190  ;;  %v1788_v7 = vld [vmem:[#allocation2 + $0x4c] sm:$0xf]  ;;  %v1592_v37 = vsel %vm3724_vm9, %v1584_v33, %v1591_v35  ;;  %v2150_v61 = vshrl.u32 %v4586_v47, 16  ;;  %v2168_v10 = vshrl.u32 %v2034_v3, 16 }
 0x1b7   : > { %2547 = vrot.lane.b32.xlu0 %v2476_v46, %s3489_s16  ;;  %v1918_v46 = vrot.slane %v1917_v62, 4  ;;  %v1601_v43 = vsel %vm3724_vm9, %v1593_v60, %v1600_v14  ;;  %v1944_v34 = vshrl.u32 %v1788_v7, 16  ;;  %v3466_v62 = vld [vmem:[%s3632_s19 + $0x20] sm:$0xff]   ;;  %v3468_v60 = vld [vmem:[%s3632_s19 + $0x28] sm:$0xff]   ;;  %v1377_v14 = vshll.u32 %v1213_v12, 16 }
 0x1b8   : > { %1641 = vrot.lane.b32.xlu1 %v1610_v63, %s3486_s30  ;;  %v1940_v63 = vshll.u32 %v1788_v7, 16  ;;  %3404 = vmatprep.mubr.msk.bf16.mxu0 %vm2913_vm12, %v3466_v62  ;;  %v2159_v7 = vshrl.u32 %v4594_v51, 16  ;;  %v2153_v12 = vshll.u32 %v4586_v47, 16 }
 0x1b9   : > { %v4566_v15 = vpop.permute.xlu0 %1724  ;;  %v1923_v8 = vsel %vm3665_vm5, %v1918_v46, %v1922_v23  ;;  %3405 = vmatmul.mubr.msk.bf16.gmra.mxu0 %vm2913_vm12, %v3468_v60 }
 0x1ba   : > { %v4573_v52 = vpop.permute.xlu1 %2529  ;;  %v1942_v39 = vrot.slane %v1940_v63, 5  ;;  %v2148_v63 = vrot.slane %v4548_v49, 4 }
 0x1bb   : > { %1409 = vrot.lane.b32.xlu0 %v1370_v21, %s3483_s24  ;;  %v1926_v21 = vrot.slane %v1924_v29, 4  ;;  %v1938_v29 = vrot.slane %v1937_v9, 4  ;;  %v1379_v9 = vrot.slane %v1377_v14, 5 }
 0x1bc   : > { %2206 = vrot.lane.b32.xlu1 %v2147_v17, %s3487_s13  ;;  %v4605_v17 = vrot.slane %v2483_v36, 5  ;;  %v1946_v36 = vrot.slane %v1944_v34, 4  ;;  %v4628_v34 = vrot.slane %v2168_v10, 7  ;;  %v2360_v10 = vld [vmem:[#allocation2 + $0x50] sm:$0xf] }
 0x1bd   : > { %v1386_v55 = vpop.permute.xlu0 %1385  ;;  %v1927_v46 = vor.u32 %v1926_v21, %v1922_v23  ;;  %v2035_v21 = vld [vmem:[#allocation2 + $0x54] sm:$0xf] }
 0x1be   : > { %1432 = vst.msk [vmem:[#allocation3 + $0x8] sm:$0xf] %vm1429_vm10, %v1386_v55  ;;  %v1392_v2 = vpop.permute.xlu1 %1391  ;;  %v2486_v33 = vsel %vm3665_vm5, %v2481_v27, %v4605_v17  ;;  %v1375_v55 = vrot.slane %v1374_v54, 4  ;;  %v2161_v27 = vrot.slane %v2159_v7, 7  ;;  %v2171_v54 = vshll.u32 %v2034_v3, 16 }
 0x1bf   : > { %1435 = vst.msk [vmem:[#allocation3 + $0x14] sm:$0xf] %vm1429_vm10, %v1392_v2  ;;  %1639 = vrot.lane.b32.xlu0 %v1601_v43, %s3486_s30  ;;  %v4619_v2 = vrot.slane %v2150_v61, 7  ;;  %v1789_v43 = vld [vmem:[#allocation2 + $0x50] sm:$0x1]  ;;  %v1928_v47 = vrot.slane %v1927_v46, 4  ;;  %v1947_v62 = vor.u32 %v1946_v36, %v1942_v39 }
 0x1c0   : > { %1637 = vrot.lane.b32.xlu1 %v1592_v37, %s3486_s30  ;;  %v1380_v49 = vsel %vm3665_vm5, %v1375_v55, %v1379_v9  ;;  %v1950_v61 = vshll.u32 %v1789_v43, 16  ;;  %v2162_v55 = vshll.u32 %v4594_v51, 16  ;;  %v2180_v36 = vshll.u32 %v2035_v21, 16 }
 0x1c1   : > { %v1955_v35 = vpop.permute.xlu0 %1954  ;;  %v2155_v60 = vor.u32 %v2153_v12, %v4619_v2 }
 0x1c2   : > { %2003 = vst.msk [vmem:[#allocation3] sm:$0xf] %vm2002_vm15, %v1955_v35  ;;  %v1622_v19 = vpop.permute.xlu1 %1621  ;;  %v2177_v35 = vshrl.u32 %v2035_v21, 16  ;;  %v1952_v7 = vrot.slane %v1950_v61, 5  ;;  %v2164_v12 = vor.u32 %v2162_v55, %v2161_v27  ;;  %v2157_v21 = vrot.slane %v4619_v2, 4 }
 0x1c3   : > { %1665 = vst.msk [vmem:[#allocation3 + $0x14] sm:$0xf] %vm1659_vm13, %v1622_v19  ;;  %1978 = vrot.lane.b32.xlu0 %v1923_v8, %s3488_s14  ;;  %v2156_v14 = vsel %vm3724_vm9, %v2148_v63, %v2155_v60  ;;  %v2166_v19 = vrot.slane %v2161_v27, 4  ;;  %v2503_v63 = vshll.u32 %v2360_v10, 16  ;;  %v2261_v61 = vld [vmem:[#allocation2 + $0x48] sm:$0xf] }
 0x1c4   : > { %1762 = vst.msk [vmem:[#allocation3 + $0x14] sm:$0xf] %vm1756_vm14, %v4390_v57  ;;  %2549 = vrot.lane.b32.xlu1 %v2486_v33, %s3489_s16  ;;  %v1943_v57 = vsel %vm3665_vm5, %v1938_v29, %v1942_v39  ;;  %v2173_v29 = vor.u32 %v2171_v54, %v4628_v34  ;;  %v1948_v39 = vrot.slane %v1947_v62, 4  ;;  %v2179_v46 = vrot.slane %v2177_v35, 7  ;;  %v2361_v27 = vld [vmem:[#allocation2 + $0x54] sm:$0xf] }
 0x1c5   : > { %v2185_v37 = vpop.permute.xlu0 %2184  ;;  %v2165_v2 = vsel %vm3724_vm9, %v2157_v21, %v2164_v12 }
 0x1c6   : > { %2233 = vst.msk [vmem:[#allocation3] sm:$0xf] %vm2232_vm0, %v2185_v37  ;;  %v4624_v23 = vpop.permute.xlu1 %2295  ;;  %v2174_v37 = vsel %vm3724_vm9, %v2166_v19, %v2173_v29  ;;  %v2513_v29 = vshll.u32 %v2361_v27, 16 }
 0x1c7   : > { %2330 = vst.msk [vmem:[#allocation3] sm:$0xf] %vm2329_vm1, %v4166_v16  ;;  %1982 = vrot.lane.b32.xlu0 %v1943_v57, %s3488_s14  ;;  %v2487_v16 = vshrl.u32 %v4575_v45, 16  ;;  %v2507_v45 = vshrl.u32 %v2360_v10, 16  ;;  %v2359_v57 = vld [vmem:[#allocation2 + $0x4c] sm:$0xf] }
 0x1c8   : > { %2576 = vst.msk [vmem:[#allocation3] sm:$0xf] %vm2575_vm2, %v4446_v42  ;;  %1411 = vrot.lane.b32.xlu1 %v1380_v49, %s3483_s24  ;;  %v1933_v42 = vsel %vm3665_vm5, %v1928_v47, %v4577_v32  ;;  %v1953_v32 = vsel %vm3665_vm5, %v1948_v39, %v1952_v7  ;;  %v2175_v49 = vrot.slane %v4628_v34, 4  ;;  %v2182_v47 = vor.u32 %v2180_v36, %v2179_v46  ;;  %v2263_v34 = vld [vmem:[#allocation2 + $0x50] sm:$0xf]  ;;  %v3470_v46 = vld [vmem:[%s3632_s19 + $0x38] sm:$0xff]  }
 0x1c9   : > { %v4639_v3 = vpop.permute.xlu0 %2188  ;;  %v2489_v9 = vrot.slane %v2487_v16, 4  ;;  %v2509_v54 = vrot.slane %v2507_v45, 4  ;;  %v2493_v35 = vshll.u32 %v2359_v57, 16  ;;  %v4666_v16 = vrot.slane %v2503_v63, 5  ;;  %v2362_v10 = vld [vmem:[#allocation2 + $0x58] sm:$0x1] }
 0x1ca   : > { %v1155_v8 = vpop.permute.xlu1 %1154  ;;  %v2183_v19 = vsel %vm3724_vm9, %v2175_v49, %v2182_v47  ;;  %v2262_v45 = vld [vmem:[#allocation2 + $0x4c] sm:$0xf]  ;;  %v2523_v63 = vshll.u32 %v2362_v10, 16 }
 0x1cb   : > { %1192 = vst.msk [vmem:[#allocation3 + $0x2c] sm:$0xf] %vm1180_vm8, %v1155_v8  ;;  %2208 = vrot.lane.b32.xlu0 %v2156_v14, %s3487_s13  ;;  %v2490_v60 = vor.u32 %v2489_v9, %v4605_v17  ;;  %v2497_v8 = vshrl.u32 %v2359_v57, 16  ;;  %v2510_v17 = vor.u32 %v2509_v54, %v4666_v16  ;;  %v2495_v7 = vrot.slane %v2493_v35, 5 }
 0x1cc   : > { %1980 = vrot.lane.b32.xlu1 %v1933_v42, %s3488_s14  ;;  %v2517_v42 = vshrl.u32 %v2361_v27, 16 }
 0x1cd   : > { %v4651_v33 = vpop.permute.xlu0 %2531  ;;  %v2491_v39 = vrot.slane %v2490_v60, 4  ;;  %v2499_v20 = vrot.slane %v2497_v8, 4 }
 0x1ce   : > { %v4654_v43 = vpop.permute.xlu1 %1726 }
 0x1cf   : > { %2212 = vrot.lane.b32.xlu0 %v2174_v37, %s3487_s13  ;;  %v2500_v55 = vor.u32 %v2499_v20, %v2495_v7  ;;  %v2264_v37 = vld [vmem:[#allocation2 + $0x54] sm:$0xf] }
 0x1d0   : > { %1984 = vrot.lane.b32.xlu1 %v1953_v32, %s3488_s14 }
 0x1d1   : > { %v1394_v51 = vpop.permute.xlu0 %1393  ;;  %v2501_v12 = vrot.slane %v2500_v55, 4 }
 0x1d2   : > { %1436 = vst.msk [vmem:[#allocation3 + $0x18] sm:$0xf] %vm1429_vm10, %v1394_v51  ;;  %v1388_v62 = vpop.permute.xlu1 %1387  ;;  %v2525_v51 = vrot.slane %v2523_v63, 5 }
 0x1d3   : > { %1433 = vst.msk [vmem:[#allocation3 + $0xc] sm:$0xf] %vm1429_vm10, %v1388_v62  ;;  %2305 = vrot.lane.b32.xlu0 %v2261_v61, %s3485_s29 }
 0x1d4   : > { %1663 = vst.msk [vmem:[#allocation3 + $0xc] sm:$0xf] %vm1659_vm13, %v4423_v5  ;;  %2210 = vrot.lane.b32.xlu1 %v2165_v2, %s3487_s13 }
 0x1d5   : > { %1760 = vst.msk [vmem:[#allocation3 + $0xc] sm:$0xf] %vm1756_vm14, %v4169_v11  ;;  %v1620_v14 = vpop.permute.xlu0 %1619  ;;  %v2511_v11 = vrot.slane %v2510_v17, 4 }
 0x1d6   : > { %2006 = vst.msk [vmem:[#allocation3 + $0xc] sm:$0xf] %vm2002_vm15, %v4538_v48  ;;  %v1957_v5 = vpop.permute.xlu1 %1956  ;;  %v2515_v48 = vrot.slane %v2513_v29, 5 }
 0x1d7   : > { %1664 = vst.msk [vmem:[#allocation3 + $0x10] sm:$0xf] %vm1659_vm13, %v1620_v14  ;;  %2309 = vrot.lane.b32.xlu0 %v2263_v34, %s3485_s29 }
 0x1d8   : > { %2236 = vst.msk [vmem:[#allocation3 + $0xc] sm:$0xf] %vm2232_vm0, %v4554_v56  ;;  %2214 = vrot.lane.b32.xlu1 %v2183_v19, %s3487_s13  ;;  %v2519_v56 = vrot.slane %v2517_v42, 4 }
 0x1d9   : > { %1761 = vst.msk [vmem:[#allocation3 + $0x10] sm:$0xf] %vm1756_vm14, %v4363_v26  ;;  %v1963_v26 = vpop.permute.xlu0 %1962 }
 0x1da   : > { %2004 = vst.msk [vmem:[#allocation3 + $0x4] sm:$0xf] %vm2002_vm15, %v1957_v5  ;;  %2007 = vst.msk [vmem:[#allocation3 + $0x10] sm:$0xf] %vm2002_vm15, %v1963_v26  ;;  %v2520_v9 = vor.u32 %v2519_v56, %v2515_v48 }
 0x1db   : > { %2333 = vst.msk [vmem:[#allocation3 + $0xc] sm:$0xf] %vm2329_vm1, %v4353_v41  ;;  %v2534_v41 = vpop.permute.xlu1 %2533 }
 0x1dc   : > { %2234 = vst.msk [vmem:[#allocation3 + $0x4] sm:$0xf] %vm2232_vm0, %v4430_v58  ;;  %v2496_v58 = vsel %vm3665_vm5, %v2491_v39, %v2495_v7  ;;  %2307 = vrot.lane.b32.xlu1 %v2262_v45, %s3485_s29  ;;  %v2521_v54 = vrot.slane %v2520_v9, 4 }
 0x1dd   : > { %2331 = vst.msk [vmem:[#allocation3 + $0x4] sm:$0xf] %vm2329_vm1, %v4180_v6  ;;  %2551 = vrot.lane.b32.xlu0 %v2496_v58, %s3489_s16  ;;  %v3469_v6 = vld [vmem:[%s3632_s19 + $0x30] sm:$0xff]   ;;  %v1616_v36 = vpop.permute.xlu0 %1615 }
 0x1de   : > { %2577 = vst.msk [vmem:[#allocation3 + $0x4] sm:$0xf] %vm2575_vm2, %v4573_v52  ;;  %2579 = vst.msk [vmem:[#allocation3 + $0xc] sm:$0xf] %vm2575_vm2, %v2534_v41  ;;  %v2516_v52 = vsel %vm3665_vm5, %v2511_v11, %v2515_v48  ;;  %3408 = vmatprep.mubr.msk.bf16.mxu0 %vm2913_vm12, %v3469_v6 }
 0x1df   : > { %1662 = vst.msk [vmem:[#allocation3 + $0x8] sm:$0xf] %vm1659_vm13, %v1616_v36  ;;  %v1396_v32 = vpop.permute.xlu1 %1395  ;;  %3409 = vmatmul.mubr.msk.bf16.gmra.mxu0 %vm2913_vm12, %v3470_v46 }
 0x1e0   : > { %1759 = vst.msk [vmem:[#allocation3 + $0x8] sm:$0xf] %vm1756_vm14, %v4151_v22  ;;  %2311 = vrot.lane.b32.xlu1 %v2264_v37, %s3485_s29 }
 0x1e1   : > { %1437 = vst.msk [vmem:[#allocation3 + $0x1c] sm:$0xf] %vm1429_vm10, %v1396_v32  ;;  %2555 = vrot.lane.b32.xlu0 %v2516_v52, %s3489_s16  ;;  %v1624_v22 = vpop.permute.xlu0 %1623 }
 0x1e2   : > { %2005 = vst.msk [vmem:[#allocation3 + $0x8] sm:$0xf] %vm2002_vm15, %v4436_v0 }
 0x1e3   : > { %1667 = vst.msk [vmem:[#allocation3 + $0x1c] sm:$0xf] %vm1659_vm13, %v4439_v31  ;;  %1666 = vst.msk [vmem:[#allocation3 + $0x18] sm:$0xf] %vm1659_vm13, %v1624_v22  ;;  %v1965_v0 = vpop.permute.xlu1 %1964 }
 0x1e4   : > { %2235 = vst.msk [vmem:[#allocation3 + $0x8] sm:$0xf] %vm2232_vm0, %v4639_v3 }
 0x1e5   : > { %1764 = vst.msk [vmem:[#allocation3 + $0x1c] sm:$0xf] %vm1756_vm14, %v4226_v4  ;;  %v3455_v57 = vld [vmem:[#allocation3] sm:$0xff]   ;;  %1763 = vst.msk [vmem:[#allocation3 + $0x18] sm:$0xf] %vm1756_vm14, %v4197_v13  ;;  %v2506_v4 = vsel %vm3665_vm5, %v2501_v12, %v4666_v16  ;;  %v2193_v13 = vpop.permute.xlu0 %2192 }
 0x1e6   : > { %2332 = vst.msk [vmem:[#allocation3 + $0x8] sm:$0xf] %vm2329_vm1, %v4320_v24  ;;  %3378 = vmatprep.mubr.msk.bf16.mxu1 %vm2684_vm3, %v3455_v57  ;;  %2553 = vrot.lane.b32.xlu1 %v2506_v4, %s3489_s16  ;;  %v2526_v24 = vsel %vm3665_vm5, %v2521_v54, %v2525_v51 }
 0x1e7   : > { %2578 = vst.msk [vmem:[#allocation3 + $0x8] sm:$0xf] %vm2575_vm2, %v4651_v33  ;;  %v1969_v31 = vpop.permute.xlu1 %1968 }
 0x1e8   : > { %2008 = vst.msk [vmem:[#allocation3 + $0x14] sm:$0xf] %vm2002_vm15, %v1965_v0  ;;  %2009 = vst.msk [vmem:[#allocation3 + $0x18] sm:$0xf] %vm2002_vm15, %v4482_v18 }
 0x1e9   : > { %2238 = vst.msk [vmem:[#allocation3 + $0x14] sm:$0xf] %vm2232_vm0, %v4450_v30  ;;  %2237 = vst.msk [vmem:[#allocation3 + $0x10] sm:$0xf] %vm2232_vm0, %v2193_v13  ;;  %v4752_v30 = vpop.permute.xlu0 %1736 }
 0x1ea   : > { %2335 = vst.msk [vmem:[#allocation3 + $0x14] sm:$0xf] %vm2329_vm1, %v4250_v50  ;;  %2334 = vst.msk [vmem:[#allocation3 + $0x10] sm:$0xf] %vm2329_vm1, %v4223_v44  ;;  %2557 = vrot.lane.b32.xlu1 %v2526_v24, %s3489_s16  ;;  %s3296_s16 = sshll.u32 %s4980_s22, 7 }
 0x1eb   : > { %2010 = vst.msk [vmem:[#allocation3 + $0x1c] sm:$0xf] %vm2002_vm15, %v1969_v31  ;;  %v2538_v50 = vpop.permute.xlu1 %2537  ;;  %s4873_s17 = scalar_lea.vmem %s4974_s12, %s3296_s16 }
 0x1ec   : > { %2580 = vst.msk [vmem:[#allocation3 + $0x10] sm:$0xf] %vm2575_vm2, %v4500_v53  ;;  %2581 = vst.msk [vmem:[#allocation3 + $0x14] sm:$0xf] %vm2575_vm2, %v2538_v50  ;;  %v4840_v50 = vld [vmem:[%s4971_s9] ss:$0 sm:$0xff] }
 0x1ed   : > { %v2197_v40 = vpop.permute.xlu0 %2196 }
 0x1ee   : > { %v3460_v18 = vld [vmem:[#allocation3 + $0x8] sm:$0xff]   ;;  %2239 = vst.msk [vmem:[#allocation3 + $0x18] sm:$0xf] %vm2232_vm0, %v2197_v40 }
 0x1ef   : > { %3379 = vmatmul.mubr.msk.bf16.vlgmr.msra.gmra.mxu1 %vm2684_vm3, %v3460_v18  ;;  %v1400_v3 = vpop.permute.xlu1 %1399  ;;  %2336 = vst.msk [vmem:[#allocation3 + $0x18] sm:$0xf] %vm2329_vm1, %v4535_v25 }
 0x1f0   : > { %1439 = vst.msk [vmem:[#allocation3 + $0x24] sm:$0xf] %vm1429_vm10, %v1400_v3  ;;  %v4846_v3 = vld [vmem:[%s4969_s7] ss:$0 sm:$0xff] }
 0x1f1   : > { %v1628_v44 = vpop.permute.xlu0 %1627 }
 0x1f2   : > { %1668 = vst.msk [vmem:[#allocation3 + $0x20] sm:$0xf] %vm1659_vm13, %v1628_v44  ;;  %v4851_v44 = vld [vmem:[%s4972_s10] ss:$0 sm:$0xff] }
 0x1f3   : > { %v1634_v53 = vpop.permute.xlu1 %1633  ;;  %v3461_v33 = vld [vmem:[#allocation3 + $0x10] sm:$0xff]   ;;  %1765 = vst.msk [vmem:[#allocation3 + $0x20] sm:$0xf] %vm1756_vm14, %v4566_v15 }
 0x1f4   : > { %3382 = vmatprep.mubr.msk.bf16.mxu1 %vm2684_vm3, %v3461_v33 }
 0x1f5   : > { %v1975_v21 = vpop.permute.xlu0 %1974 }
 0x1f7   : > { %v2203_v49 = vpop.permute.xlu1 %2202 }
 0x1f9   : > { %v2544_v47 = vpop.permute.xlu0 %2543 }
 0x1fb   : > { %v4764_v62 = vpop.permute.xlu1 %1738 }
 0x1fd   : > { %v1406_v61 = vpop.permute.xlu0 %1405 }
 0x1fe   : > { %1442 = vst.msk [vmem:[#allocation3 + $0x30] sm:$0xf] %vm1429_vm10, %v1406_v61 }
 0x1ff   : > { %v2199_v25 = vpop.permute.xlu1 %2198 }
 0x200   : > { %2240 = vst.msk [vmem:[#allocation3 + $0x1c] sm:$0xf] %vm2232_vm0, %v2199_v25 }
 0x201   : > { %2337 = vst.msk [vmem:[#allocation3 + $0x1c] sm:$0xf] %vm2329_vm1, %v4624_v23  ;;  %v2302_v60 = vpop.permute.xlu0 %2301 }
 0x203   : > { %v1630_v35 = vpop.permute.xlu1 %1629 }
 0x204   : > { %1669 = vst.msk [vmem:[#allocation3 + $0x24] sm:$0xf] %vm1659_vm13, %v1630_v35 }
 0x205   : > { %1766 = vst.msk [vmem:[#allocation3 + $0x24] sm:$0xf] %vm1756_vm14, %v4654_v43  ;;  %v1161_v15 = vpop.permute.xlu0 %1160 }
 0x206   : > { %1195 = vst.msk [vmem:[#allocation3 + $0x38] sm:$0xf] %vm1180_vm8, %v1161_v15 }
 0x207   : > { %v2304_v16 = vpop.permute.xlu1 %2303 }
 0x209   : > { %v1733_v27 = vpop.permute.xlu0 %1732 }
 0x20b   : > { %v1163_v2 = vpop.permute.xlu1 %1162 }
 0x20c   : > { %1196 = vst.msk [vmem:[#allocation3 + $0x3c] sm:$0xf] %vm1180_vm8, %v1163_v2 }
 0x20d   : > { %v2540_v8 = vpop.permute.xlu0 %2539 }
 0x20e   : > { %2582 = vst.msk [vmem:[#allocation3 + $0x18] sm:$0xf] %vm2575_vm2, %v2540_v8 }
 0x20f   : > { %v1735_v34 = vpop.permute.xlu1 %1734 }
 0x211   : > { %v1402_v23 = vpop.permute.xlu0 %1401 }
 0x212   : > { %1440 = vst.msk [vmem:[#allocation3 + $0x28] sm:$0xf] %vm1429_vm10, %v1402_v23 }
 0x213   : > { %v2542_v17 = vpop.permute.xlu1 %2541 }
 0x214   : > { %2583 = vst.msk [vmem:[#allocation3 + $0x1c] sm:$0xf] %vm2575_vm2, %v2542_v17 }
 0x215   : > { %v1971_v14 = vpop.permute.xlu0 %1970 }
 0x216   : > { %2011 = vst.msk [vmem:[#allocation3 + $0x20] sm:$0xf] %vm2002_vm15, %v1971_v14 }
 0x217   : > { %v1404_v43 = vpop.permute.xlu1 %1403 }
 0x218   : > { %1441 = vst.msk [vmem:[#allocation3 + $0x2c] sm:$0xf] %vm1429_vm10, %v1404_v43 }
 0x219   : > { %1671 = vst.msk [vmem:[#allocation3 + $0x2c] sm:$0xf] %vm1659_vm13, %v1634_v53  ;;  %v1632_v19 = vpop.permute.xlu0 %1631 }
 0x21a   : > { %1768 = vst.msk [vmem:[#allocation3 + $0x2c] sm:$0xf] %vm1756_vm14, %v4467_v1 }
 0x21b   : > { %1670 = vst.msk [vmem:[#allocation3 + $0x28] sm:$0xf] %vm1659_vm13, %v1632_v19  ;;  %v1973_v29 = vpop.permute.xlu1 %1972  ;;  %v3463_v42 = vld [vmem:[#allocation3 + $0x18] sm:$0xff]  }
 0x21c   : > { %1767 = vst.msk [vmem:[#allocation3 + $0x28] sm:$0xf] %vm1756_vm14, %v4383_v28  ;;  %3383 = vmatmul.mubr.msk.bf16.gmra.mxu1 %vm2684_vm3, %v3463_v42 }
 0x21d   : > { %2012 = vst.msk [vmem:[#allocation3 + $0x24] sm:$0xf] %vm2002_vm15, %v1973_v29  ;;  %2013 = vst.msk [vmem:[#allocation3 + $0x28] sm:$0xf] %vm2002_vm15, %v1975_v21  ;;  %v2201_v1 = vpop.permute.xlu0 %2200 }
 0x21e   : > { %2242 = vst.msk [vmem:[#allocation3 + $0x24] sm:$0xf] %vm2232_vm0, %v2203_v49  ;;  %2241 = vst.msk [vmem:[#allocation3 + $0x20] sm:$0xf] %vm2232_vm0, %v2201_v1  ;;  %v4857_v49 = vld [vmem:[%s4970_s8] ss:$0 sm:$0xff] }
 0x21f   : > { %2339 = vst.msk [vmem:[#allocation3 + $0x24] sm:$0xf] %vm2329_vm1, %v4487_v59  ;;  %v1977_v5 = vpop.permute.xlu1 %1976  ;;  %2338 = vst.msk [vmem:[#allocation3 + $0x20] sm:$0xf] %vm2329_vm1, %v4401_v38 }
 0x220   : > { %2014 = vst.msk [vmem:[#allocation3 + $0x2c] sm:$0xf] %vm2002_vm15, %v1977_v5 }
 0x221   : > { %2584 = vst.msk [vmem:[#allocation3 + $0x20] sm:$0xf] %vm2575_vm2, %v2544_v47  ;;  %v2205_v28 = vpop.permute.xlu0 %2204 }
 0x222   : > { %2243 = vst.msk [vmem:[#allocation3 + $0x28] sm:$0xf] %vm2232_vm0, %v2205_v28 }
 0x223   : > { %v2546_v39 = vpop.permute.xlu1 %2545  ;;  %2340 = vst.msk [vmem:[#allocation3 + $0x28] sm:$0xf] %vm2329_vm1, %v2302_v60 }
 0x224   : > { %2585 = vst.msk [vmem:[#allocation3 + $0x24] sm:$0xf] %vm2575_vm2, %v2546_v39 }
 0x225   : > { %v1636_v59 = vpop.permute.xlu0 %1635 }
 0x226   : > { %1672 = vst.msk [vmem:[#allocation3 + $0x30] sm:$0xf] %vm1659_vm13, %v1636_v59 }
 0x227   : > { %v1408_v7 = vpop.permute.xlu1 %1407  ;;  %1769 = vst.msk [vmem:[#allocation3 + $0x30] sm:$0xf] %vm1756_vm14, %v1733_v27 }
 0x228   : > { %1443 = vst.msk [vmem:[#allocation3 + $0x34] sm:$0xf] %vm1429_vm10, %v1408_v7 }
 0x229   : > { %v2548_v38 = vpop.permute.xlu0 %2547 }
 0x22a   : > { %2586 = vst.msk [vmem:[#allocation3 + $0x28] sm:$0xf] %vm2575_vm2, %v2548_v38 }
 0x22b   : > { %v1642_v20 = vpop.permute.xlu1 %1641  ;;  %v3465_v11 = vld [vmem:[#allocation3 + $0x20] sm:$0xff]  }
 0x22c   : > { %3386 = vmatprep.mubr.msk.bf16.mxu1 %vm2684_vm3, %v3465_v11 }
 0x22d   : > { %v1410_v26 = vpop.permute.xlu0 %1409 }
 0x22e   : > { %1444 = vst.msk [vmem:[#allocation3 + $0x38] sm:$0xf] %vm1429_vm10, %v1410_v26 }
 0x22f   : > { %v2207_v48 = vpop.permute.xlu1 %2206 }
 0x230   : > { %2244 = vst.msk [vmem:[#allocation3 + $0x2c] sm:$0xf] %vm2232_vm0, %v2207_v48 }
 0x231   : > { %2341 = vst.msk [vmem:[#allocation3 + $0x2c] sm:$0xf] %vm2329_vm1, %v2304_v16  ;;  %v1640_v56 = vpop.permute.xlu0 %1639 }
 0x232   : > { %1674 = vst.msk [vmem:[#allocation3 + $0x38] sm:$0xf] %vm1659_vm13, %v1640_v56 }
 0x233   : > { %v1638_v41 = vpop.permute.xlu1 %1637  ;;  %1771 = vst.msk [vmem:[#allocation3 + $0x38] sm:$0xf] %vm1756_vm14, %v4752_v30 }
 0x234   : > { %1673 = vst.msk [vmem:[#allocation3 + $0x34] sm:$0xf] %vm1659_vm13, %v1638_v41 }
 0x235   : > { %1770 = vst.msk [vmem:[#allocation3 + $0x34] sm:$0xf] %vm1756_vm14, %v1735_v34  ;;  %v1979_v58 = vpop.permute.xlu0 %1978 }
 0x236   : > { %2015 = vst.msk [vmem:[#allocation3 + $0x30] sm:$0xf] %vm2002_vm15, %v1979_v58 }
 0x237   : > { %v2550_v10 = vpop.permute.xlu1 %2549 }
 0x238   : > { %2587 = vst.msk [vmem:[#allocation3 + $0x2c] sm:$0xf] %vm2575_vm2, %v2550_v10 }
 0x239   : > { %v1983_v45 = vpop.permute.xlu0 %1982 }
 0x23a   : > { %2017 = vst.msk [vmem:[#allocation3 + $0x38] sm:$0xf] %vm2002_vm15, %v1983_v45 }
 0x23b   : > { %v1412_v55 = vpop.permute.xlu1 %1411 }
 0x23c   : > { %1445 = vst.msk [vmem:[#allocation3 + $0x3c] sm:$0xf] %vm1429_vm10, %v1412_v55 }
 0x23d   : > { %1675 = vst.msk [vmem:[#allocation3 + $0x3c] sm:$0xf] %vm1659_vm13, %v1642_v20  ;;  %v2209_v6 = vpop.permute.xlu0 %2208 }
 0x23e   : > { %1772 = vst.msk [vmem:[#allocation3 + $0x3c] sm:$0xf] %vm1756_vm14, %v4764_v62 }
 0x23f   : > { %2245 = vst.msk [vmem:[#allocation3 + $0x30] sm:$0xf] %vm2232_vm0, %v2209_v6  ;;  %v1981_v46 = vpop.permute.xlu1 %1980  ;;  %v3467_v52 = vld [vmem:[#allocation3 + $0x28] sm:$0xff]  }
 0x240   : > { %2016 = vst.msk [vmem:[#allocation3 + $0x34] sm:$0xf] %vm2002_vm15, %v1981_v46  ;;  %3387 = vmatmul.mubr.msk.bf16.gmra.mxu1 %vm2684_vm3, %v3467_v52 }
 0x241   : > { %v2213_v36 = vpop.permute.xlu0 %2212  ;;  %v3398_v31 = vpop.f32.mrf.mxu0 }
 0x242   : > { %2247 = vst.msk [vmem:[#allocation3 + $0x38] sm:$0xf] %vm2232_vm0, %v2213_v36  ;;  %v3047_v40 = vmul.f32 %v3398_v31, %v4840_v50 }
 0x243   : > { %v1985_v37 = vpop.permute.xlu1 %1984  ;;  %v2975_v30 = vpop.f32.mrf.mxu0 }
 0x244   : > { %2018 = vst.msk [vmem:[#allocation3 + $0x3c] sm:$0xf] %vm2002_vm15, %v1985_v37  ;;  %v3045_v53 = vmul.f32 %v4840_v50, %v2975_v30  ;;  %v3070_v62 = vadd.f32 %v4851_v44, %v3047_v40 }
 0x245   : > { %v2306_v9 = vpop.permute.xlu0 %2305  ;;  %v3399_v18 = vpop.f32.mrf.mxu0 }
 0x246   : > { %2342 = vst.msk [vmem:[#allocation3 + $0x30] sm:$0xf] %vm2329_vm1, %v2306_v9  ;;  %v3048_v61 = vmul.f32 %v3399_v18, %v4840_v50  ;;  %v3068_v16 = vadd.f32 %v4851_v44, %v3045_v53 }
 0x247   : > { %v2211_v63 = vpop.permute.xlu1 %2210  ;;  %v2978_v33 = vpop.f32.mrf.mxu0 }
 0x248   : > { %2246 = vst.msk [vmem:[#allocation3 + $0x34] sm:$0xf] %vm2232_vm0, %v2211_v63  ;;  %v3046_v60 = vmul.f32 %v4840_v50, %v2978_v33  ;;  %v3071_v23 = vadd.f32 %v4851_v44, %v3048_v61 }
 0x249   : > { %v2310_v32 = vpop.permute.xlu0 %2309 }
 0x24a   : > { %2344 = vst.msk [vmem:[#allocation3 + $0x38] sm:$0xf] %vm2329_vm1, %v2310_v32  ;;  %v3069_v14 = vadd.f32 %v4851_v44, %v3046_v60 }
 0x24b   : > { %v2215_v12 = vpop.permute.xlu1 %2214 }
 0x24c   : > { %2248 = vst.msk [vmem:[#allocation3 + $0x3c] sm:$0xf] %vm2232_vm0, %v2215_v12 }
 0x24f   : > { %v2552_v22 = vpop.permute.xlu0 %2551  ;;  %v2308_v57 = vpop.permute.xlu1 %2307 }
 0x250   : > { %2588 = vst.msk [vmem:[#allocation3 + $0x30] sm:$0xf] %vm2575_vm2, %v2552_v22  ;;  %v3402_v38 = vpop.f32.mrf.mxu0 }
 0x251   : > { %2343 = vst.msk [vmem:[#allocation3 + $0x34] sm:$0xf] %vm2329_vm1, %v2308_v57  ;;  %v3051_v26 = vmul.f32 %v3402_v38, %v4840_v50 }
 0x252   : > { %v2991_v20 = vpop.f32.mrf.mxu0 }
 0x253   : > { %v2556_v54 = vpop.permute.xlu0 %2555  ;;  %v2312_v51 = vpop.permute.xlu1 %2311  ;;  %v3049_v48 = vmul.f32 %v4840_v50, %v2991_v20  ;;  %v3074_v10 = vadd.f32 %v4851_v44, %v3051_v26 }
 0x254   : > { %2590 = vst.msk [vmem:[#allocation3 + $0x38] sm:$0xf] %vm2575_vm2, %v2556_v54  ;;  %v3403_v11 = vpop.f32.mrf.mxu0 }
 0x255   : > { %2345 = vst.msk [vmem:[#allocation3 + $0x3c] sm:$0xf] %vm2329_vm1, %v2312_v51  ;;  %v3052_v45 = vmul.f32 %v3403_v11, %v4840_v50  ;;  %v3072_v36 = vadd.f32 %v4851_v44, %v3049_v48 }
 0x256   : > { %v2994_v56 = vpop.f32.mrf.mxu0 }
 0x257   : > { %v3050_v6 = vmul.f32 %v4840_v50, %v2994_v56  ;;  %v3075_v12 = vadd.f32 %v4851_v44, %v3052_v45 }
 0x258   : > { %v2554_v0 = vpop.permute.xlu1 %2553 }
 0x259   : > { %2589 = vst.msk [vmem:[#allocation3 + $0x34] sm:$0xf] %vm2575_vm2, %v2554_v0  ;;  %v3073_v57 = vadd.f32 %v4851_v44, %v3050_v6 }
 0x25c   : > { %v2558_v4 = vpop.permute.xlu1 %2557 }
 0x25d   : > { %2591 = vst.msk [vmem:[#allocation3 + $0x3c] sm:$0xf] %vm2575_vm2, %v2558_v4 }
 0x260   : > { %v3471_v13 = vld [vmem:[#allocation3 + $0x30] sm:$0xff]  }
 0x261   : > { %3390 = vmatprep.mubr.msk.bf16.mxu1 %vm2684_vm3, %v3471_v13 }
 0x264   : > { %v3472_v24 = vld [vmem:[#allocation3 + $0x38] sm:$0xff]  }
 0x265   : > { %3391 = vmatmul.mubr.msk.bf16.gmra.mxu1 %vm2684_vm3, %v3472_v24 }
 0x279   : > { %v3406_v53 = vpop.f32.mrf.mxu0 }
 0x27b   : > { %v3007_v33 = vpop.f32.mrf.mxu0 }
 0x2af   : > { %v3380_v21 = vpop.f32.mrf.mxu1 }
 0x2b0   : > { %v2819_v47 = vmul.f32 %v3380_v21, %v4846_v3  ;;  %v3407_v21 = vpop.f32.mrf.mxu0 }
 0x2b1   : > { %v2747_v25 = vpop.f32.mrf.mxu1 }
 0x2b2   : > { %v2842_v35 = vadd.f32 %v4857_v49, %v2819_v47  ;;  %v2817_v15 = vmul.f32 %v4846_v3, %v2747_v25  ;;  %v3055_v47 = vmul.f32 %v3406_v53, %v4840_v50  ;;  %v3010_v61 = vpop.f32.mrf.mxu0 }
 0x2b3   : > { %v3381_v27 = vpop.f32.mrf.mxu1 }
 0x2b4   : > { %v3086_v2 = vadd.f32 %v3070_v62, %v2842_v35  ;;  %v2840_v8 = vadd.f32 %v4857_v49, %v2817_v15  ;;  %v2820_v34 = vmul.f32 %v3381_v27, %v4846_v3  ;;  %v3053_v62 = vmul.f32 %v4840_v50, %v3007_v33  ;;  %v3410_v48 = vpop.f32.mrf.mxu0 }
 0x2b5   : > { %v2750_v17 = vpop.f32.mrf.mxu1  ;;  %v3078_v35 = vadd.f32 %v4851_v44, %v3055_v47  ;;  %v3056_v15 = vmul.f32 %v3407_v21, %v4840_v50  ;;  %v3054_v27 = vmul.f32 %v4840_v50, %v3010_v61 }
 0x2b6   : > { %v3102_v43 = vmax.f32 %v3086_v2, 0.0  ;;  %v3084_v19 = vadd.f32 %v3068_v16, %v2840_v8  ;;  %v2843_v29 = vadd.f32 %v4857_v49, %v2820_v34  ;;  %v2818_v42 = vmul.f32 %v4846_v3, %v2750_v17  ;;  %v3023_v56 = vpop.f32.mrf.mxu0 }
 0x2b7   : > { %v3076_v34 = vadd.f32 %v4851_v44, %v3053_v62 }
 0x2b8   : > { %3119 = vst.msk [vmem:[%s4873_s17 + $0x10] sm:$0xff] %vm3116_vm4, %v3102_v43  ;;  %v3100_v1 = vmax.f32 %v3084_v19, 0.0  ;;  %v3087_v5 = vadd.f32 %v3071_v23, %v2843_v29  ;;  %v2841_v28 = vadd.f32 %v4857_v49, %v2818_v42  ;;  %v3079_v19 = vadd.f32 %v4851_v44, %v3056_v15 }
 0x2b9   : > { %v3077_v42 = vadd.f32 %v4851_v44, %v3054_v27 }
 0x2ba   : > { %3117 = vst.msk [vmem:[%s4873_s17] sm:$0xff] %vm3116_vm4, %v3100_v1  ;;  %v3103_v39 = vmax.f32 %v3087_v5, 0.0  ;;  %v3085_v59 = vadd.f32 %v3069_v14, %v2841_v28 }
 0x2bc   : > { %3120 = vst.msk [vmem:[%s4873_s17 + $0x18] sm:$0xff] %vm3116_vm4, %v3103_v39  ;;  %v3101_v7 = vmax.f32 %v3085_v59, 0.0 }
 0x2be   : > { %3118 = vst.msk [vmem:[%s4873_s17 + $0x8] sm:$0xff] %vm3116_vm4, %v3101_v7 }
 0x2dc   : > { %v3384_v41 = vpop.f32.mrf.mxu1 }
 0x2dd   : > { %v2823_v58 = vmul.f32 %v3384_v41, %v4846_v3  ;;  %v3059_v41 = vmul.f32 %v3410_v48, %v4840_v50 }
 0x2de   : > { %v2763_v55 = vpop.f32.mrf.mxu1 }
 0x2df   : > { %v2846_v46 = vadd.f32 %v4857_v49, %v2823_v58  ;;  %v2821_v52 = vmul.f32 %v4846_v3, %v2763_v55  ;;  %v3411_v58 = vpop.f32.mrf.mxu0  ;;  %v3082_v55 = vadd.f32 %v4851_v44, %v3059_v41 }
 0x2e0   : > { %v3385_v37 = vpop.f32.mrf.mxu1 }
 0x2e1   : > { %v3090_v9 = vadd.f32 %v3074_v10, %v2846_v46  ;;  %v2844_v63 = vadd.f32 %v4857_v49, %v2821_v52  ;;  %v2824_v32 = vmul.f32 %v3385_v37, %v4846_v3  ;;  %v3057_v10 = vmul.f32 %v4840_v50, %v3023_v56  ;;  %v3026_v52 = vpop.f32.mrf.mxu0 }
 0x2e2   : > { %v2766_v22 = vpop.f32.mrf.mxu1  ;;  %v3060_v46 = vmul.f32 %v3411_v58, %v4840_v50 }
 0x2e3   : > { %v3106_v54 = vmax.f32 %v3090_v9, 0.0  ;;  %v3088_v51 = vadd.f32 %v3072_v36, %v2844_v63  ;;  %v2847_v0 = vadd.f32 %v4857_v49, %v2824_v32  ;;  %v2822_v4 = vmul.f32 %v4846_v3, %v2766_v22 }
 0x2e4   : > { %v3080_v63 = vadd.f32 %v4851_v44, %v3057_v10  ;;  %v3058_v22 = vmul.f32 %v4840_v50, %v3026_v52 }
 0x2e5   : > { %3123 = vst.msk [vmem:[%s4873_s17 + $0x30] sm:$0xff] %vm3116_vm4, %v3106_v54  ;;  %v3104_v13 = vmax.f32 %v3088_v51, 0.0  ;;  %v3091_v24 = vadd.f32 %v3075_v12, %v2847_v0  ;;  %v2845_v31 = vadd.f32 %v4857_v49, %v2822_v4  ;;  %v3083_v51 = vadd.f32 %v4851_v44, %v3060_v46 }
 0x2e7   : > { %3121 = vst.msk [vmem:[%s4873_s17 + $0x20] sm:$0xff] %vm3116_vm4, %v3104_v13  ;;  %v3107_v30 = vmax.f32 %v3091_v24, 0.0  ;;  %v3089_v18 = vadd.f32 %v3073_v57, %v2845_v31 }
 0x2e9   : > { %3124 = vst.msk [vmem:[%s4873_s17 + $0x38] sm:$0xff] %vm3116_vm4, %v3107_v30  ;;  %v3105_v40 = vmax.f32 %v3089_v18, 0.0  ;;  %v3081_v30 = vadd.f32 %v4851_v44, %v3058_v22 }
 0x2eb   : > { %3122 = vst.msk [vmem:[%s4873_s17 + $0x28] sm:$0xff] %vm3116_vm4, %v3105_v40 }
 0x300   : > { %v3388_v25 = vpop.f32.mrf.mxu1 }
 0x301   : > { %v2827_v60 = vmul.f32 %v3388_v25, %v4846_v3 }
 0x302   : > { %v2779_v16 = vpop.f32.mrf.mxu1 }
 0x303   : > { %v2850_v2 = vadd.f32 %v4857_v49, %v2827_v60  ;;  %v2825_v8 = vmul.f32 %v4846_v3, %v2779_v16 }
 0x304   : > { %v3389_v23 = vpop.f32.mrf.mxu1 }
 0x305   : > { %v3094_v17 = vadd.f32 %v3078_v35, %v2850_v2  ;;  %v2848_v14 = vadd.f32 %v4857_v49, %v2825_v8  ;;  %v2828_v43 = vmul.f32 %v3389_v23, %v4846_v3 }
 0x306   : > { %v2782_v29 = vpop.f32.mrf.mxu1 }
 0x307   : > { %v3110_v1 = vmax.f32 %v3094_v17, 0.0  ;;  %v3092_v5 = vadd.f32 %v3076_v34, %v2848_v14  ;;  %v2851_v28 = vadd.f32 %v4857_v49, %v2828_v43  ;;  %v2826_v39 = vmul.f32 %v4846_v3, %v2782_v29 }
 0x309   : > { %3127 = vst.msk [vmem:[%s4873_s17 + $0x50] sm:$0xff] %vm3116_vm4, %v3110_v1  ;;  %v3108_v59 = vmax.f32 %v3092_v5, 0.0  ;;  %v3095_v7 = vadd.f32 %v3079_v19, %v2851_v28  ;;  %v2849_v38 = vadd.f32 %v4857_v49, %v2826_v39 }
 0x30b   : > { %3125 = vst.msk [vmem:[%s4873_s17 + $0x40] sm:$0xff] %vm3116_vm4, %v3108_v59  ;;  %v3111_v20 = vmax.f32 %v3095_v7, 0.0  ;;  %v3093_v11 = vadd.f32 %v3077_v42, %v2849_v38 }
 0x30d   : > { %3128 = vst.msk [vmem:[%s4873_s17 + $0x58] sm:$0xff] %vm3116_vm4, %v3111_v20  ;;  %v3109_v26 = vmax.f32 %v3093_v11, 0.0 }
 0x30f   : > { %3126 = vst.msk [vmem:[%s4873_s17 + $0x48] sm:$0xff] %vm3116_vm4, %v3109_v26 }
 0x325   : > { %v3392_v45 = vpop.f32.mrf.mxu1 }
 0x326   : > { %v2831_v6 = vmul.f32 %v3392_v45, %v4846_v3 }
 0x327   : > { %v2795_v36 = vpop.f32.mrf.mxu1 }
 0x328   : > { %v2854_v37 = vadd.f32 %v4857_v49, %v2831_v6  ;;  %v2829_v9 = vmul.f32 %v4846_v3, %v2795_v36 }
 0x329   : > { %v3393_v32 = vpop.f32.mrf.mxu1 }
 0x32a   : > { %v3098_v12 = vadd.f32 %v3082_v55, %v2854_v37  ;;  %v2852_v57 = vadd.f32 %v4857_v49, %v2829_v9  ;;  %v2832_v54 = vmul.f32 %v3393_v32, %v4846_v3 }
 0x32b   : > { %v2798_v0 = vpop.f32.mrf.mxu1 }
 0x32c   : > { %v3114_v4 = vmax.f32 %v3098_v12, 0.0  ;;  %v3096_v13 = vadd.f32 %v3080_v63, %v2852_v57  ;;  %v2855_v24 = vadd.f32 %v4857_v49, %v2832_v54  ;;  %v2830_v31 = vmul.f32 %v4846_v3, %v2798_v0 }
 0x32e   : > { %3131 = vst.msk [vmem:[%s4873_s17 + $0x70] sm:$0xff] %vm3116_vm4, %v3114_v4  ;;  %v3112_v50 = vmax.f32 %v3096_v13, 0.0  ;;  %v3099_v18 = vadd.f32 %v3083_v51, %v2855_v24  ;;  %v2853_v40 = vadd.f32 %v4857_v49, %v2830_v31 }
 0x330   : > { %3129 = vst.msk [vmem:[%s4873_s17 + $0x60] sm:$0xff] %vm3116_vm4, %v3112_v50  ;;  %v3115_v53 = vmax.f32 %v3099_v18, 0.0  ;;  %v3097_v33 = vadd.f32 %v3081_v30, %v2853_v40 }
 0x332   : > { %3132 = vst.msk [vmem:[%s4873_s17 + $0x78] sm:$0xff] %vm3116_vm4, %v3115_v53  ;;  %v3113_v21 = vmax.f32 %v3097_v33, 0.0 }
 0x334   : > { %3130 = vst.msk [vmem:[%s4873_s17 + $0x68] sm:$0xff] %vm3116_vm4, %v3113_v21 }
 0x335 PF: > { %s22_s21 = sadd.s32 1, %s3479_s21  }
 0x336   : > { %p19_p4 = scmp.ge.s32.totalorder %s22_s21, 4  }
 0x338   :  { %21 = sbr.rel (!%p19_p4) target bundleno = 1 (0x1), region = 101 }

</bundles_post_ra>
